<compile_context>
chip_gen: v6e
topology: v6e:2x2x1
jax: 0.10.0
libtpu: 0.0.40
codegen_flags: <defaults>
</compile_context>

<pallas_src>
import jax
import jax.numpy as jnp
from jax.experimental import pallas as pl
from jax.experimental.pallas import tpu as pltpu

BN_EPS = 1e-5


# ---------------------------------------------------------------------------
# Fused Pallas kernel (built per static block structure)
# ---------------------------------------------------------------------------

def _make_fused_kernel(has_proj, weight_dtype):
    """Returns a kernel computing the full UNet forward for one batch block.

    has_proj: tuple[bool] -- per ResidualBlock, True if the shortcut is a
        Linear projection (in_features != out_features), False for Identity.
    """

    def kernel(x_ref, t_ref, te_w1_ref, te_b1_ref, te_w2_ref, te_b2_ref, *rest):
        out_ref = rest[-1]
        prm = rest[:-1]

        x = x_ref[...]                                   # [Bb, input_dim] f32
        t = t_ref[...]                                   # [Bb, 1]         f32

        # --- time embedding: Linear(1,T) -> ReLU -> Linear(T,T) -------------
        # First layer has K=1 -> broadcast multiply (VPU) instead of a
        # degenerate MXU matmul.
        h = t * te_w1_ref[...].astype(jnp.float32) + te_b1_ref[...]
        h = jnp.maximum(h, 0.0)
        t_embed = (
            jnp.dot(h.astype(weight_dtype), te_w2_ref[...],
                    preferred_element_type=jnp.float32)
            + te_b2_ref[...]
        )

        # torch.cat([x, t_embed], dim=-1) on VMEM-resident values.
        z = jnp.concatenate([x, t_embed], axis=-1)

        # --- 6 ResidualBlocks, all in one kernel body ------------------------
        idx = 0
        for proj in has_proj:
            w1, b1, w2, b2 = prm[idx], prm[idx + 1], prm[idx + 2], prm[idx + 3]
            idx += 4
            zb = z.astype(weight_dtype)                  # single cast, reused below
            h = jnp.dot(zb, w1[...],
                        preferred_element_type=jnp.float32) + b1[...]
            h = jnp.maximum(h, 0.0)                      # ReLU (Dropout = id)
            h = jnp.dot(h.astype(weight_dtype), w2[...],
                        preferred_element_type=jnp.float32) + b2[...]
            h = jnp.maximum(h, 0.0)                      # ReLU (Dropout = id)
            if proj:
                wr, br = prm[idx], prm[idx + 1]
                idx += 2
                res = jnp.dot(zb, wr[...],
                              preferred_element_type=jnp.float32) + br[...]
            else:
                res = z                                  # Identity shortcut
            z = h + res

        out_ref[...] = z

    return kernel


# ---------------------------------------------------------------------------
# Parameter setup (deterministic init + folding eval-mode BN into Linear)
# ---------------------------------------------------------------------------

def _linear_params(key, din, dout):
    kw, kb = jax.random.split(key)
    bound = 1.0 / (din ** 0.5)
    w = jax.random.uniform(kw, (din, dout), jnp.float32, -bound, bound)
    b = jax.random.uniform(kb, (1, dout), jnp.float32, -bound, bound)
    return w, b


def _fold_bn(w, b, gamma, beta, rm, rv, eps=BN_EPS):
    # eval-mode BN(y) = (y - rm) / sqrt(rv + eps) * gamma + beta -> fold into
    # the preceding Linear.
    s = gamma / jnp.sqrt(rv + eps)
    return w * s[None, :], b * s[None, :] + (beta - rm * s)[None, :]


def _residual_block_params(key, din, dout, weight_dtype):
    k1, k2, kr = jax.random.split(key, 3)
    w1, b1 = _linear_params(k1, din, dout)
    w2, b2 = _linear_params(k2, dout, dout)
    gamma = jnp.ones((dout,), jnp.float32)
    beta = jnp.zeros((dout,), jnp.float32)
    rm = jnp.zeros((dout,), jnp.float32)
    rv = jnp.ones((dout,), jnp.float32)
    w1, b1 = _fold_bn(w1, b1, gamma, beta, rm, rv)
    w2, b2 = _fold_bn(w2, b2, gamma, beta, rm, rv)
    blk = dict(w1=w1.astype(weight_dtype), b1=b1,
               w2=w2.astype(weight_dtype), b2=b2)
    if din != dout:
        wr, br = _linear_params(kr, din, dout)
        blk["wr"] = wr.astype(weight_dtype)
        blk["br"] = br
    # else: nn.Identity() shortcut -> direct add in the kernel (no eye matmul).
    return blk


def init_unet_params(key, input_dim, hidden_dim, time_embed_dim,
                     weight_dtype=jnp.bfloat16):
    keys = jax.random.split(key, 8)
    te_w1, te_b1 = _linear_params(keys[0], 1, time_embed_dim)
    te_w2, te_b2 = _linear_params(keys[1], time_embed_dim, time_embed_dim)
    block_dims = [
        (input_dim + time_embed_dim, hidden_dim),   # encoder1
        (hidden_dim, hidden_dim * 2),               # encoder2
        (hidden_dim * 2, hidden_dim * 4),           # encoder3
        (hidden_dim * 4, hidden_dim * 2),           # decoder1
        (hidden_dim * 2, hidden_dim),               # decoder2
        (hidden_dim, input_dim),                    # decoder3
    ]
    blocks = [
        _residual_block_params(keys[2 + i], din, dout, weight_dtype)
        for i, (din, dout) in enumerate(block_dims)
    ]
    return dict(te_w1=te_w1.astype(weight_dtype), te_b1=te_b1,
                te_w2=te_w2.astype(weight_dtype), te_b2=te_b2,
                blocks=blocks)


# ---------------------------------------------------------------------------
# Forward pass wrapper (single fused pallas_call)
# ---------------------------------------------------------------------------

def _cost_estimate(Bp, time_embed_dim, blocks, flat_params, x, t2, out_dim):
    flops = 2 * Bp * 1 * time_embed_dim + 2 * Bp * time_embed_dim * time_embed_dim
    for blk in blocks:
        din, dout = blk["w1"].shape
        flops += 2 * Bp * din * dout + 2 * Bp * dout * dout
        if "wr" in blk:
            flops += 2 * Bp * din * dout
    bytes_accessed = (
        x.size * x.dtype.itemsize
        + t2.size * t2.dtype.itemsize
        + sum(int(p.size) * p.dtype.itemsize for p in flat_params)
        + Bp * out_dim * 4
    )
    return pl.CostEstimate(flops=int(flops), transcendentals=0,
                           bytes_accessed=int(bytes_accessed))


def unet_forward(params, x, t):
    """x: [B, input_dim] f32, t: [B] f32 -> [B, input_dim] f32."""
    B, input_dim = x.shape
    t2 = t.reshape(B, 1).astype(jnp.float32)            # t.unsqueeze(-1)

    blocks = params["blocks"]
    has_proj = tuple("wr" in blk for blk in blocks)
    out_dim = blocks[-1]["w1"].shape[1]
    weight_dtype = params["te_w2"].dtype

    # Batch tiling: single sublane-aligned block for small B; 128-row parallel
    # blocks otherwise (shards across v7x's two TensorCores).
    if B <= 128:
        block_b = ((B + 7) // 8) * 8                     # f32 sublane = 8
        Bp = block_b
    else:
        block_b = 128
        Bp = pl.cdiv(B, block_b) * block_b
    if Bp != B:
        pad = Bp - B
        x = jnp.pad(x, ((0, pad), (0, 0)))
        t2 = jnp.pad(t2, ((0, pad), (0, 0)))

    flat_params = [params["te_w1"], params["te_b1"],
                   params["te_w2"], params["te_b2"]]
    for blk in blocks:
        flat_params += [blk["w1"], blk["b1"], blk["w2"], blk["b2"]]
        if "wr" in blk:
            flat_params += [blk["wr"], blk["br"]]

    def _resident(arr):
        # Full-array block, same index every grid step -> stays resident in VMEM.
        return pl.BlockSpec(arr.shape, lambda i: (0, 0))

    in_specs = (
        [pl.BlockSpec((block_b, input_dim), lambda i: (i, 0)),
         pl.BlockSpec((block_b, 1), lambda i: (i, 0))]
        + [_resident(p) for p in flat_params]
    )
    out_spec = pl.BlockSpec((block_b, out_dim), lambda i: (i, 0))

    kernel = _make_fused_kernel(has_proj, weight_dtype)

    out = pl.pallas_call(
        kernel,
        out_shape=jax.ShapeDtypeStruct((Bp, out_dim), jnp.float32),
        grid=(Bp // block_b,),
        in_specs=in_specs,
        out_specs=out_spec,
        compiler_params=pltpu.CompilerParams(
            dimension_semantics=("parallel",)),
        cost_estimate=_cost_estimate(Bp, params["te_w2"].shape[0], blocks,
                                     flat_params, x, t2, out_dim),
    )(x, t2, *flat_params)
    return out[:B]


# ---------------------------------------------------------------------------
# Pure-JAX reference (mirrors the kernel's bf16 matmul inputs / f32 accum)
# ---------------------------------------------------------------------------

def unet_forward_ref(params, x, t):
    B = x.shape[0]
    t2 = t.reshape(B, 1).astype(jnp.float32)
    wdt = params["te_w2"].dtype
    h = jnp.maximum(t2 * params["te_w1"].astype(jnp.float32) + params["te_b1"], 0.0)
    t_embed = (jnp.dot(h.astype(wdt), params["te_w2"],
                       preferred_element_type=jnp.float32) + params["te_b2"])
    z = jnp.concatenate([x, t_embed], axis=-1)
    for blk in params["blocks"]:
        zb = z.astype(wdt)
        h = jnp.maximum(jnp.dot(zb, blk["w1"],
                                preferred_element_type=jnp.float32) + blk["b1"], 0.0)
        h = jnp.maximum(jnp.dot(h.astype(wdt), blk["w2"],
                                preferred_element_type=jnp.float32) + blk["b2"], 0.0)
        if "wr" in blk:
            res = jnp.dot(zb, blk["wr"],
                          preferred_element_type=jnp.float32) + blk["br"]
        else:
            res = z
        z = h + res
    return z


if __name__ == "__main__":
    key = jax.random.PRNGKey(0)
    kp, kx, kt = jax.random.split(key, 3)

    input_dim, hidden_dim, time_embed_dim = 16, 32, 16
    batch = 8

    params = init_unet_params(kp, input_dim, hidden_dim, time_embed_dim)
    x = jax.random.normal(kx, (batch, input_dim), jnp.float32)
    t = jax.random.uniform(kt, (batch,), jnp.float32)

    out = jax.jit(unet_forward)(params, x, t)
    out = jax.block_until_ready(out)

    assert out.shape == (batch, input_dim)
    assert out.dtype == jnp.float32
    assert bool(jnp.all(jnp.isfinite(out)))

    ref = jax.block_until_ready(jax.jit(unet_forward_ref)(params, x, t))
    max_err = float(jnp.max(jnp.abs(out - ref)))
    assert max_err < 1e-2, f"kernel/reference mismatch: max_err={max_err}"

    print("KERNEL_OK")
</pallas_src>

<mosaic_0001>
module attributes {stable_mosaic.version = 11 : i64} {
  func.func @kernel(%arg0: i32, %arg1: memref<8x16xf32, #tpu.memory_space<vmem>>, %arg2: memref<8x1xf32, #tpu.memory_space<vmem>>, %arg3: memref<1x16xbf16, #tpu.memory_space<vmem>>, %arg4: memref<1x16xf32, #tpu.memory_space<vmem>>, %arg5: memref<16x16xbf16, #tpu.memory_space<vmem>>, %arg6: memref<1x16xf32, #tpu.memory_space<vmem>>, %arg7: memref<32x32xbf16, #tpu.memory_space<vmem>>, %arg8: memref<1x32xf32, #tpu.memory_space<vmem>>, %arg9: memref<32x32xbf16, #tpu.memory_space<vmem>>, %arg10: memref<1x32xf32, #tpu.memory_space<vmem>>, %arg11: memref<32x64xbf16, #tpu.memory_space<vmem>>, %arg12: memref<1x64xf32, #tpu.memory_space<vmem>>, %arg13: memref<64x64xbf16, #tpu.memory_space<vmem>>, %arg14: memref<1x64xf32, #tpu.memory_space<vmem>>, %arg15: memref<32x64xbf16, #tpu.memory_space<vmem>>, %arg16: memref<1x64xf32, #tpu.memory_space<vmem>>, %arg17: memref<64x128xbf16, #tpu.memory_space<vmem>>, %arg18: memref<1x128xf32, #tpu.memory_space<vmem>>, %arg19: memref<128x128xbf16, #tpu.memory_space<vmem>>, %arg20: memref<1x128xf32, #tpu.memory_space<vmem>>, %arg21: memref<64x128xbf16, #tpu.memory_space<vmem>>, %arg22: memref<1x128xf32, #tpu.memory_space<vmem>>, %arg23: memref<128x64xbf16, #tpu.memory_space<vmem>>, %arg24: memref<1x64xf32, #tpu.memory_space<vmem>>, %arg25: memref<64x64xbf16, #tpu.memory_space<vmem>>, %arg26: memref<1x64xf32, #tpu.memory_space<vmem>>, %arg27: memref<128x64xbf16, #tpu.memory_space<vmem>>, %arg28: memref<1x64xf32, #tpu.memory_space<vmem>>, %arg29: memref<64x32xbf16, #tpu.memory_space<vmem>>, %arg30: memref<1x32xf32, #tpu.memory_space<vmem>>, %arg31: memref<32x32xbf16, #tpu.memory_space<vmem>>, %arg32: memref<1x32xf32, #tpu.memory_space<vmem>>, %arg33: memref<64x32xbf16, #tpu.memory_space<vmem>>, %arg34: memref<1x32xf32, #tpu.memory_space<vmem>>, %arg35: memref<32x16xbf16, #tpu.memory_space<vmem>>, %arg36: memref<1x16xf32, #tpu.memory_space<vmem>>, %arg37: memref<16x16xbf16, #tpu.memory_space<vmem>>, %arg38: memref<1x16xf32, #tpu.memory_space<vmem>>, %arg39: memref<32x16xbf16, #tpu.memory_space<vmem>>, %arg40: memref<1x16xf32, #tpu.memory_space<vmem>>, %arg41: memref<8x16xf32, #tpu.memory_space<vmem>>) attributes {dimension_semantics = [#tpu.dimension_semantics<parallel>], iteration_bounds = array<i64: 1>, scalar_prefetch = 0 : i64, scratch_operands = 0 : i64, tpu.core_type = #tpu.core_type<tc>, window_params = [{transform_indices = @transform_0, window_bounds = array<i64: 8, 16>}, {transform_indices = @transform_1, window_bounds = array<i64: 8, 1>}, {pipeline_mode = #tpu.pipeline_mode<synchronous>, transform_indices = @transform_2, window_bounds = array<i64: 1, 16>}, {pipeline_mode = #tpu.pipeline_mode<synchronous>, transform_indices = @transform_3, window_bounds = array<i64: 1, 16>}, {pipeline_mode = #tpu.pipeline_mode<synchronous>, transform_indices = @transform_4, window_bounds = array<i64: 16, 16>}, {pipeline_mode = #tpu.pipeline_mode<synchronous>, transform_indices = @transform_5, window_bounds = array<i64: 1, 16>}, {pipeline_mode = #tpu.pipeline_mode<synchronous>, transform_indices = @transform_6, window_bounds = array<i64: 32, 32>}, {pipeline_mode = #tpu.pipeline_mode<synchronous>, transform_indices = @transform_7, window_bounds = array<i64: 1, 32>}, {pipeline_mode = #tpu.pipeline_mode<synchronous>, transform_indices = @transform_8, window_bounds = array<i64: 32, 32>}, {pipeline_mode = #tpu.pipeline_mode<synchronous>, transform_indices = @transform_9, window_bounds = array<i64: 1, 32>}, {pipeline_mode = #tpu.pipeline_mode<synchronous>, transform_indices = @transform_10, window_bounds = array<i64: 32, 64>}, {pipeline_mode = #tpu.pipeline_mode<synchronous>, transform_indices = @transform_11, window_bounds = array<i64: 1, 64>}, {pipeline_mode = #tpu.pipeline_mode<synchronous>, transform_indices = @transform_12, window_bounds = array<i64: 64, 64>}, {pipeline_mode = #tpu.pipeline_mode<synchronous>, transform_indices = @transform_13, window_bounds = array<i64: 1, 64>}, {pipeline_mode = #tpu.pipeline_mode<synchronous>, transform_indices = @transform_14, window_bounds = array<i64: 32, 64>}, {pipeline_mode = #tpu.pipeline_mode<synchronous>, transform_indices = @transform_15, window_bounds = array<i64: 1, 64>}, {pipeline_mode = #tpu.pipeline_mode<synchronous>, transform_indices = @transform_16, window_bounds = array<i64: 64, 128>}, {pipeline_mode = #tpu.pipeline_mode<synchronous>, transform_indices = @transform_17, window_bounds = array<i64: 1, 128>}, {pipeline_mode = #tpu.pipeline_mode<synchronous>, transform_indices = @transform_18, window_bounds = array<i64: 128, 128>}, {pipeline_mode = #tpu.pipeline_mode<synchronous>, transform_indices = @transform_19, window_bounds = array<i64: 1, 128>}, {pipeline_mode = #tpu.pipeline_mode<synchronous>, transform_indices = @transform_20, window_bounds = array<i64: 64, 128>}, {pipeline_mode = #tpu.pipeline_mode<synchronous>, transform_indices = @transform_21, window_bounds = array<i64: 1, 128>}, {pipeline_mode = #tpu.pipeline_mode<synchronous>, transform_indices = @transform_22, window_bounds = array<i64: 128, 64>}, {pipeline_mode = #tpu.pipeline_mode<synchronous>, transform_indices = @transform_23, window_bounds = array<i64: 1, 64>}, {pipeline_mode = #tpu.pipeline_mode<synchronous>, transform_indices = @transform_24, window_bounds = array<i64: 64, 64>}, {pipeline_mode = #tpu.pipeline_mode<synchronous>, transform_indices = @transform_25, window_bounds = array<i64: 1, 64>}, {pipeline_mode = #tpu.pipeline_mode<synchronous>, transform_indices = @transform_26, window_bounds = array<i64: 128, 64>}, {pipeline_mode = #tpu.pipeline_mode<synchronous>, transform_indices = @transform_27, window_bounds = array<i64: 1, 64>}, {pipeline_mode = #tpu.pipeline_mode<synchronous>, transform_indices = @transform_28, window_bounds = array<i64: 64, 32>}, {pipeline_mode = #tpu.pipeline_mode<synchronous>, transform_indices = @transform_29, window_bounds = array<i64: 1, 32>}, {pipeline_mode = #tpu.pipeline_mode<synchronous>, transform_indices = @transform_30, window_bounds = array<i64: 32, 32>}, {pipeline_mode = #tpu.pipeline_mode<synchronous>, transform_indices = @transform_31, window_bounds = array<i64: 1, 32>}, {pipeline_mode = #tpu.pipeline_mode<synchronous>, transform_indices = @transform_32, window_bounds = array<i64: 64, 32>}, {pipeline_mode = #tpu.pipeline_mode<synchronous>, transform_indices = @transform_33, window_bounds = array<i64: 1, 32>}, {pipeline_mode = #tpu.pipeline_mode<synchronous>, transform_indices = @transform_34, window_bounds = array<i64: 32, 16>}, {pipeline_mode = #tpu.pipeline_mode<synchronous>, transform_indices = @transform_35, window_bounds = array<i64: 1, 16>}, {pipeline_mode = #tpu.pipeline_mode<synchronous>, transform_indices = @transform_36, window_bounds = array<i64: 16, 16>}, {pipeline_mode = #tpu.pipeline_mode<synchronous>, transform_indices = @transform_37, window_bounds = array<i64: 1, 16>}, {pipeline_mode = #tpu.pipeline_mode<synchronous>, transform_indices = @transform_38, window_bounds = array<i64: 32, 16>}, {pipeline_mode = #tpu.pipeline_mode<synchronous>, transform_indices = @transform_39, window_bounds = array<i64: 1, 16>}, {transform_indices = @transform_40, window_bounds = array<i64: 8, 16>}]} {
    %c0 = arith.constant 0 : index
    %c0_0 = arith.constant 0 : index
    %0 = vector.load %arg1[%c0, %c0_0] : memref<8x16xf32, #tpu.memory_space<vmem>>, vector<8x16xf32>
    %c0_1 = arith.constant 0 : index
    %c0_2 = arith.constant 0 : index
    %1 = vector.load %arg2[%c0_1, %c0_2] : memref<8x1xf32, #tpu.memory_space<vmem>>, vector<8x1xf32>
    %c0_3 = arith.constant 0 : index
    %c0_4 = arith.constant 0 : index
    %2 = vector.load %arg3[%c0_3, %c0_4] : memref<1x16xbf16, #tpu.memory_space<vmem>>, vector<1x16xbf16>
    %3 = arith.extf %2 : vector<1x16xbf16> to vector<1x16xf32>
    %4 = vector.broadcast %1 : vector<8x1xf32> to vector<8x16xf32>
    %5 = vector.broadcast %3 : vector<1x16xf32> to vector<8x16xf32>
    %6 = arith.mulf %4, %5 : vector<8x16xf32>
    %c0_5 = arith.constant 0 : index
    %c0_6 = arith.constant 0 : index
    %7 = vector.load %arg4[%c0_5, %c0_6] : memref<1x16xf32, #tpu.memory_space<vmem>>, vector<1x16xf32>
    %8 = vector.broadcast %7 : vector<1x16xf32> to vector<8x16xf32>
    %9 = arith.addf %6, %8 : vector<8x16xf32>
    %cst = arith.constant 0.000000e+00 : f32
    %10 = vector.broadcast %cst : f32 to vector<8x16xf32>
    %11 = arith.maximumf %9, %10 : vector<8x16xf32>
    %12 = arith.truncf %11 : vector<8x16xf32> to vector<8x16xbf16>
    %c0_7 = arith.constant 0 : index
    %c0_8 = arith.constant 0 : index
    %13 = vector.load %arg5[%c0_7, %c0_8] : memref<16x16xbf16, #tpu.memory_space<vmem>>, vector<16x16xbf16>
    %cst_9 = arith.constant dense<0.000000e+00> : vector<8x16xf32>
    %14 = tpu.matmul %12, %13, %cst_9 {dimension_numbers = #tpu.dot_dimension_numbers<[1], [0], [0], [1], [0, 0, 1, 1], [], []>} : vector<8x16xbf16>, vector<16x16xbf16>, vector<8x16xf32> -> vector<8x16xf32>
    %c0_10 = arith.constant 0 : index
    %c0_11 = arith.constant 0 : index
    %15 = vector.load %arg6[%c0_10, %c0_11] : memref<1x16xf32, #tpu.memory_space<vmem>>, vector<1x16xf32>
    %16 = vector.broadcast %15 : vector<1x16xf32> to vector<8x16xf32>
    %17 = arith.addf %14, %16 : vector<8x16xf32>
    %18 = tpu.concatenate %0, %17 in 1 : vector<8x16xf32>, vector<8x16xf32> -> vector<8x32xf32>
    %19 = arith.truncf %18 : vector<8x32xf32> to vector<8x32xbf16>
    %c0_12 = arith.constant 0 : index
    %c0_13 = arith.constant 0 : index
    %20 = vector.load %arg7[%c0_12, %c0_13] : memref<32x32xbf16, #tpu.memory_space<vmem>>, vector<32x32xbf16>
    %cst_14 = arith.constant dense<0.000000e+00> : vector<8x32xf32>
    %21 = tpu.matmul %19, %20, %cst_14 {dimension_numbers = #tpu.dot_dimension_numbers<[1], [0], [0], [1], [0, 0, 1, 1], [], []>} : vector<8x32xbf16>, vector<32x32xbf16>, vector<8x32xf32> -> vector<8x32xf32>
    %c0_15 = arith.constant 0 : index
    %c0_16 = arith.constant 0 : index
    %22 = vector.load %arg8[%c0_15, %c0_16] : memref<1x32xf32, #tpu.memory_space<vmem>>, vector<1x32xf32>
    %23 = vector.broadcast %22 : vector<1x32xf32> to vector<8x32xf32>
    %24 = arith.addf %21, %23 : vector<8x32xf32>
    %cst_17 = arith.constant 0.000000e+00 : f32
    %25 = vector.broadcast %cst_17 : f32 to vector<8x32xf32>
    %26 = arith.maximumf %24, %25 : vector<8x32xf32>
    %27 = arith.truncf %26 : vector<8x32xf32> to vector<8x32xbf16>
    %c0_18 = arith.constant 0 : index
    %c0_19 = arith.constant 0 : index
    %28 = vector.load %arg9[%c0_18, %c0_19] : memref<32x32xbf16, #tpu.memory_space<vmem>>, vector<32x32xbf16>
    %cst_20 = arith.constant dense<0.000000e+00> : vector<8x32xf32>
    %29 = tpu.matmul %27, %28, %cst_20 {dimension_numbers = #tpu.dot_dimension_numbers<[1], [0], [0], [1], [0, 0, 1, 1], [], []>} : vector<8x32xbf16>, vector<32x32xbf16>, vector<8x32xf32> -> vector<8x32xf32>
    %c0_21 = arith.constant 0 : index
    %c0_22 = arith.constant 0 : index
    %30 = vector.load %arg10[%c0_21, %c0_22] : memref<1x32xf32, #tpu.memory_space<vmem>>, vector<1x32xf32>
    %31 = vector.broadcast %30 : vector<1x32xf32> to vector<8x32xf32>
    %32 = arith.addf %29, %31 : vector<8x32xf32>
    %cst_23 = arith.constant 0.000000e+00 : f32
    %33 = vector.broadcast %cst_23 : f32 to vector<8x32xf32>
    %34 = arith.maximumf %32, %33 : vector<8x32xf32>
    %35 = arith.addf %34, %18 : vector<8x32xf32>
    %36 = arith.truncf %35 : vector<8x32xf32> to vector<8x32xbf16>
    %c0_24 = arith.constant 0 : index
    %c0_25 = arith.constant 0 : index
    %37 = vector.load %arg11[%c0_24, %c0_25] : memref<32x64xbf16, #tpu.memory_space<vmem>>, vector<32x64xbf16>
    %cst_26 = arith.constant dense<0.000000e+00> : vector<8x64xf32>
    %38 = tpu.matmul %36, %37, %cst_26 {dimension_numbers = #tpu.dot_dimension_numbers<[1], [0], [0], [1], [0, 0, 1, 1], [], []>} : vector<8x32xbf16>, vector<32x64xbf16>, vector<8x64xf32> -> vector<8x64xf32>
    %c0_27 = arith.constant 0 : index
    %c0_28 = arith.constant 0 : index
    %39 = vector.load %arg12[%c0_27, %c0_28] : memref<1x64xf32, #tpu.memory_space<vmem>>, vector<1x64xf32>
    %40 = vector.broadcast %39 : vector<1x64xf32> to vector<8x64xf32>
    %41 = arith.addf %38, %40 : vector<8x64xf32>
    %cst_29 = arith.constant 0.000000e+00 : f32
    %42 = vector.broadcast %cst_29 : f32 to vector<8x64xf32>
    %43 = arith.maximumf %41, %42 : vector<8x64xf32>
    %44 = arith.truncf %43 : vector<8x64xf32> to vector<8x64xbf16>
    %c0_30 = arith.constant 0 : index
    %c0_31 = arith.constant 0 : index
    %45 = vector.load %arg13[%c0_30, %c0_31] : memref<64x64xbf16, #tpu.memory_space<vmem>>, vector<64x64xbf16>
    %cst_32 = arith.constant dense<0.000000e+00> : vector<8x64xf32>
    %46 = tpu.matmul %44, %45, %cst_32 {dimension_numbers = #tpu.dot_dimension_numbers<[1], [0], [0], [1], [0, 0, 1, 1], [], []>} : vector<8x64xbf16>, vector<64x64xbf16>, vector<8x64xf32> -> vector<8x64xf32>
    %c0_33 = arith.constant 0 : index
    %c0_34 = arith.constant 0 : index
    %47 = vector.load %arg14[%c0_33, %c0_34] : memref<1x64xf32, #tpu.memory_space<vmem>>, vector<1x64xf32>
    %48 = vector.broadcast %47 : vector<1x64xf32> to vector<8x64xf32>
    %49 = arith.addf %46, %48 : vector<8x64xf32>
    %cst_35 = arith.constant 0.000000e+00 : f32
    %50 = vector.broadcast %cst_35 : f32 to vector<8x64xf32>
    %51 = arith.maximumf %49, %50 : vector<8x64xf32>
    %c0_36 = arith.constant 0 : index
    %c0_37 = arith.constant 0 : index
    %52 = vector.load %arg15[%c0_36, %c0_37] : memref<32x64xbf16, #tpu.memory_space<vmem>>, vector<32x64xbf16>
    %cst_38 = arith.constant dense<0.000000e+00> : vector<8x64xf32>
    %53 = tpu.matmul %36, %52, %cst_38 {dimension_numbers = #tpu.dot_dimension_numbers<[1], [0], [0], [1], [0, 0, 1, 1], [], []>} : vector<8x32xbf16>, vector<32x64xbf16>, vector<8x64xf32> -> vector<8x64xf32>
    %c0_39 = arith.constant 0 : index
    %c0_40 = arith.constant 0 : index
    %54 = vector.load %arg16[%c0_39, %c0_40] : memref<1x64xf32, #tpu.memory_space<vmem>>, vector<1x64xf32>
    %55 = vector.broadcast %54 : vector<1x64xf32> to vector<8x64xf32>
    %56 = arith.addf %53, %55 : vector<8x64xf32>
    %57 = arith.addf %51, %56 : vector<8x64xf32>
    %58 = arith.truncf %57 : vector<8x64xf32> to vector<8x64xbf16>
    %c0_41 = arith.constant 0 : index
    %c0_42 = arith.constant 0 : index
    %59 = vector.load %arg17[%c0_41, %c0_42] : memref<64x128xbf16, #tpu.memory_space<vmem>>, vector<64x128xbf16>
    %cst_43 = arith.constant dense<0.000000e+00> : vector<8x128xf32>
    %60 = tpu.matmul %58, %59, %cst_43 {dimension_numbers = #tpu.dot_dimension_numbers<[1], [0], [0], [1], [0, 0, 1, 1], [], []>} : vector<8x64xbf16>, vector<64x128xbf16>, vector<8x128xf32> -> vector<8x128xf32>
    %c0_44 = arith.constant 0 : index
    %c0_45 = arith.constant 0 : index
    %61 = vector.load %arg18[%c0_44, %c0_45] : memref<1x128xf32, #tpu.memory_space<vmem>>, vector<1x128xf32>
    %62 = vector.broadcast %61 : vector<1x128xf32> to vector<8x128xf32>
    %63 = arith.addf %60, %62 : vector<8x128xf32>
    %cst_46 = arith.constant 0.000000e+00 : f32
    %64 = vector.broadcast %cst_46 : f32 to vector<8x128xf32>
    %65 = arith.maximumf %63, %64 : vector<8x128xf32>
    %66 = arith.truncf %65 : vector<8x128xf32> to vector<8x128xbf16>
    %c0_47 = arith.constant 0 : index
    %c0_48 = arith.constant 0 : index
    %67 = vector.load %arg19[%c0_47, %c0_48] : memref<128x128xbf16, #tpu.memory_space<vmem>>, vector<128x128xbf16>
    %cst_49 = arith.constant dense<0.000000e+00> : vector<8x128xf32>
    %68 = tpu.matmul %66, %67, %cst_49 {dimension_numbers = #tpu.dot_dimension_numbers<[1], [0], [0], [1], [0, 0, 1, 1], [], []>} : vector<8x128xbf16>, vector<128x128xbf16>, vector<8x128xf32> -> vector<8x128xf32>
    %c0_50 = arith.constant 0 : index
    %c0_51 = arith.constant 0 : index
    %69 = vector.load %arg20[%c0_50, %c0_51] : memref<1x128xf32, #tpu.memory_space<vmem>>, vector<1x128xf32>
    %70 = vector.broadcast %69 : vector<1x128xf32> to vector<8x128xf32>
    %71 = arith.addf %68, %70 : vector<8x128xf32>
    %cst_52 = arith.constant 0.000000e+00 : f32
    %72 = vector.broadcast %cst_52 : f32 to vector<8x128xf32>
    %73 = arith.maximumf %71, %72 : vector<8x128xf32>
    %c0_53 = arith.constant 0 : index
    %c0_54 = arith.constant 0 : index
    %74 = vector.load %arg21[%c0_53, %c0_54] : memref<64x128xbf16, #tpu.memory_space<vmem>>, vector<64x128xbf16>
    %cst_55 = arith.constant dense<0.000000e+00> : vector<8x128xf32>
    %75 = tpu.matmul %58, %74, %cst_55 {dimension_numbers = #tpu.dot_dimension_numbers<[1], [0], [0], [1], [0, 0, 1, 1], [], []>} : vector<8x64xbf16>, vector<64x128xbf16>, vector<8x128xf32> -> vector<8x128xf32>
    %c0_56 = arith.constant 0 : index
    %c0_57 = arith.constant 0 : index
    %76 = vector.load %arg22[%c0_56, %c0_57] : memref<1x128xf32, #tpu.memory_space<vmem>>, vector<1x128xf32>
    %77 = vector.broadcast %76 : vector<1x128xf32> to vector<8x128xf32>
    %78 = arith.addf %75, %77 : vector<8x128xf32>
    %79 = arith.addf %73, %78 : vector<8x128xf32>
    %80 = arith.truncf %79 : vector<8x128xf32> to vector<8x128xbf16>
    %c0_58 = arith.constant 0 : index
    %c0_59 = arith.constant 0 : index
    %81 = vector.load %arg23[%c0_58, %c0_59] : memref<128x64xbf16, #tpu.memory_space<vmem>>, vector<128x64xbf16>
    %cst_60 = arith.constant dense<0.000000e+00> : vector<8x64xf32>
    %82 = tpu.matmul %80, %81, %cst_60 {dimension_numbers = #tpu.dot_dimension_numbers<[1], [0], [0], [1], [0, 0, 1, 1], [], []>} : vector<8x128xbf16>, vector<128x64xbf16>, vector<8x64xf32> -> vector<8x64xf32>
    %c0_61 = arith.constant 0 : index
    %c0_62 = arith.constant 0 : index
    %83 = vector.load %arg24[%c0_61, %c0_62] : memref<1x64xf32, #tpu.memory_space<vmem>>, vector<1x64xf32>
    %84 = vector.broadcast %83 : vector<1x64xf32> to vector<8x64xf32>
    %85 = arith.addf %82, %84 : vector<8x64xf32>
    %cst_63 = arith.constant 0.000000e+00 : f32
    %86 = vector.broadcast %cst_63 : f32 to vector<8x64xf32>
    %87 = arith.maximumf %85, %86 : vector<8x64xf32>
    %88 = arith.truncf %87 : vector<8x64xf32> to vector<8x64xbf16>
    %c0_64 = arith.constant 0 : index
    %c0_65 = arith.constant 0 : index
    %89 = vector.load %arg25[%c0_64, %c0_65] : memref<64x64xbf16, #tpu.memory_space<vmem>>, vector<64x64xbf16>
    %cst_66 = arith.constant dense<0.000000e+00> : vector<8x64xf32>
    %90 = tpu.matmul %88, %89, %cst_66 {dimension_numbers = #tpu.dot_dimension_numbers<[1], [0], [0], [1], [0, 0, 1, 1], [], []>} : vector<8x64xbf16>, vector<64x64xbf16>, vector<8x64xf32> -> vector<8x64xf32>
    %c0_67 = arith.constant 0 : index
    %c0_68 = arith.constant 0 : index
    %91 = vector.load %arg26[%c0_67, %c0_68] : memref<1x64xf32, #tpu.memory_space<vmem>>, vector<1x64xf32>
    %92 = vector.broadcast %91 : vector<1x64xf32> to vector<8x64xf32>
    %93 = arith.addf %90, %92 : vector<8x64xf32>
    %cst_69 = arith.constant 0.000000e+00 : f32
    %94 = vector.broadcast %cst_69 : f32 to vector<8x64xf32>
    %95 = arith.maximumf %93, %94 : vector<8x64xf32>
    %c0_70 = arith.constant 0 : index
    %c0_71 = arith.constant 0 : index
    %96 = vector.load %arg27[%c0_70, %c0_71] : memref<128x64xbf16, #tpu.memory_space<vmem>>, vector<128x64xbf16>
    %cst_72 = arith.constant dense<0.000000e+00> : vector<8x64xf32>
    %97 = tpu.matmul %80, %96, %cst_72 {dimension_numbers = #tpu.dot_dimension_numbers<[1], [0], [0], [1], [0, 0, 1, 1], [], []>} : vector<8x128xbf16>, vector<128x64xbf16>, vector<8x64xf32> -> vector<8x64xf32>
    %c0_73 = arith.constant 0 : index
    %c0_74 = arith.constant 0 : index
    %98 = vector.load %arg28[%c0_73, %c0_74] : memref<1x64xf32, #tpu.memory_space<vmem>>, vector<1x64xf32>
    %99 = vector.broadcast %98 : vector<1x64xf32> to vector<8x64xf32>
    %100 = arith.addf %97, %99 : vector<8x64xf32>
    %101 = arith.addf %95, %100 : vector<8x64xf32>
    %102 = arith.truncf %101 : vector<8x64xf32> to vector<8x64xbf16>
    %c0_75 = arith.constant 0 : index
    %c0_76 = arith.constant 0 : index
    %103 = vector.load %arg29[%c0_75, %c0_76] : memref<64x32xbf16, #tpu.memory_space<vmem>>, vector<64x32xbf16>
    %cst_77 = arith.constant dense<0.000000e+00> : vector<8x32xf32>
    %104 = tpu.matmul %102, %103, %cst_77 {dimension_numbers = #tpu.dot_dimension_numbers<[1], [0], [0], [1], [0, 0, 1, 1], [], []>} : vector<8x64xbf16>, vector<64x32xbf16>, vector<8x32xf32> -> vector<8x32xf32>
    %c0_78 = arith.constant 0 : index
    %c0_79 = arith.constant 0 : index
    %105 = vector.load %arg30[%c0_78, %c0_79] : memref<1x32xf32, #tpu.memory_space<vmem>>, vector<1x32xf32>
    %106 = vector.broadcast %105 : vector<1x32xf32> to vector<8x32xf32>
    %107 = arith.addf %104, %106 : vector<8x32xf32>
    %cst_80 = arith.constant 0.000000e+00 : f32
    %108 = vector.broadcast %cst_80 : f32 to vector<8x32xf32>
    %109 = arith.maximumf %107, %108 : vector<8x32xf32>
    %110 = arith.truncf %109 : vector<8x32xf32> to vector<8x32xbf16>
    %c0_81 = arith.constant 0 : index
    %c0_82 = arith.constant 0 : index
    %111 = vector.load %arg31[%c0_81, %c0_82] : memref<32x32xbf16, #tpu.memory_space<vmem>>, vector<32x32xbf16>
    %cst_83 = arith.constant dense<0.000000e+00> : vector<8x32xf32>
    %112 = tpu.matmul %110, %111, %cst_83 {dimension_numbers = #tpu.dot_dimension_numbers<[1], [0], [0], [1], [0, 0, 1, 1], [], []>} : vector<8x32xbf16>, vector<32x32xbf16>, vector<8x32xf32> -> vector<8x32xf32>
    %c0_84 = arith.constant 0 : index
    %c0_85 = arith.constant 0 : index
    %113 = vector.load %arg32[%c0_84, %c0_85] : memref<1x32xf32, #tpu.memory_space<vmem>>, vector<1x32xf32>
    %114 = vector.broadcast %113 : vector<1x32xf32> to vector<8x32xf32>
    %115 = arith.addf %112, %114 : vector<8x32xf32>
    %cst_86 = arith.constant 0.000000e+00 : f32
    %116 = vector.broadcast %cst_86 : f32 to vector<8x32xf32>
    %117 = arith.maximumf %115, %116 : vector<8x32xf32>
    %c0_87 = arith.constant 0 : index
    %c0_88 = arith.constant 0 : index
    %118 = vector.load %arg33[%c0_87, %c0_88] : memref<64x32xbf16, #tpu.memory_space<vmem>>, vector<64x32xbf16>
    %cst_89 = arith.constant dense<0.000000e+00> : vector<8x32xf32>
    %119 = tpu.matmul %102, %118, %cst_89 {dimension_numbers = #tpu.dot_dimension_numbers<[1], [0], [0], [1], [0, 0, 1, 1], [], []>} : vector<8x64xbf16>, vector<64x32xbf16>, vector<8x32xf32> -> vector<8x32xf32>
    %c0_90 = arith.constant 0 : index
    %c0_91 = arith.constant 0 : index
    %120 = vector.load %arg34[%c0_90, %c0_91] : memref<1x32xf32, #tpu.memory_space<vmem>>, vector<1x32xf32>
    %121 = vector.broadcast %120 : vector<1x32xf32> to vector<8x32xf32>
    %122 = arith.addf %119, %121 : vector<8x32xf32>
    %123 = arith.addf %117, %122 : vector<8x32xf32>
    %124 = arith.truncf %123 : vector<8x32xf32> to vector<8x32xbf16>
    %c0_92 = arith.constant 0 : index
    %c0_93 = arith.constant 0 : index
    %125 = vector.load %arg35[%c0_92, %c0_93] : memref<32x16xbf16, #tpu.memory_space<vmem>>, vector<32x16xbf16>
    %cst_94 = arith.constant dense<0.000000e+00> : vector<8x16xf32>
    %126 = tpu.matmul %124, %125, %cst_94 {dimension_numbers = #tpu.dot_dimension_numbers<[1], [0], [0], [1], [0, 0, 1, 1], [], []>} : vector<8x32xbf16>, vector<32x16xbf16>, vector<8x16xf32> -> vector<8x16xf32>
    %c0_95 = arith.constant 0 : index
    %c0_96 = arith.constant 0 : index
    %127 = vector.load %arg36[%c0_95, %c0_96] : memref<1x16xf32, #tpu.memory_space<vmem>>, vector<1x16xf32>
    %128 = vector.broadcast %127 : vector<1x16xf32> to vector<8x16xf32>
    %129 = arith.addf %126, %128 : vector<8x16xf32>
    %cst_97 = arith.constant 0.000000e+00 : f32
    %130 = vector.broadcast %cst_97 : f32 to vector<8x16xf32>
    %131 = arith.maximumf %129, %130 : vector<8x16xf32>
    %132 = arith.truncf %131 : vector<8x16xf32> to vector<8x16xbf16>
    %c0_98 = arith.constant 0 : index
    %c0_99 = arith.constant 0 : index
    %133 = vector.load %arg37[%c0_98, %c0_99] : memref<16x16xbf16, #tpu.memory_space<vmem>>, vector<16x16xbf16>
    %cst_100 = arith.constant dense<0.000000e+00> : vector<8x16xf32>
    %134 = tpu.matmul %132, %133, %cst_100 {dimension_numbers = #tpu.dot_dimension_numbers<[1], [0], [0], [1], [0, 0, 1, 1], [], []>} : vector<8x16xbf16>, vector<16x16xbf16>, vector<8x16xf32> -> vector<8x16xf32>
    %c0_101 = arith.constant 0 : index
    %c0_102 = arith.constant 0 : index
    %135 = vector.load %arg38[%c0_101, %c0_102] : memref<1x16xf32, #tpu.memory_space<vmem>>, vector<1x16xf32>
    %136 = vector.broadcast %135 : vector<1x16xf32> to vector<8x16xf32>
    %137 = arith.addf %134, %136 : vector<8x16xf32>
    %cst_103 = arith.constant 0.000000e+00 : f32
    %138 = vector.broadcast %cst_103 : f32 to vector<8x16xf32>
    %139 = arith.maximumf %137, %138 : vector<8x16xf32>
    %c0_104 = arith.constant 0 : index
    %c0_105 = arith.constant 0 : index
    %140 = vector.load %arg39[%c0_104, %c0_105] : memref<32x16xbf16, #tpu.memory_space<vmem>>, vector<32x16xbf16>
    %cst_106 = arith.constant dense<0.000000e+00> : vector<8x16xf32>
    %141 = tpu.matmul %124, %140, %cst_106 {dimension_numbers = #tpu.dot_dimension_numbers<[1], [0], [0], [1], [0, 0, 1, 1], [], []>} : vector<8x32xbf16>, vector<32x16xbf16>, vector<8x16xf32> -> vector<8x16xf32>
    %c0_107 = arith.constant 0 : index
    %c0_108 = arith.constant 0 : index
    %142 = vector.load %arg40[%c0_107, %c0_108] : memref<1x16xf32, #tpu.memory_space<vmem>>, vector<1x16xf32>
    %143 = vector.broadcast %142 : vector<1x16xf32> to vector<8x16xf32>
    %144 = arith.addf %141, %143 : vector<8x16xf32>
    %145 = arith.addf %139, %144 : vector<8x16xf32>
    %c0_109 = arith.constant 0 : index
    %c0_110 = arith.constant 0 : index
    %146 = vector.load %arg41[%c0_109, %c0_110] : memref<8x16xf32, #tpu.memory_space<vmem>>, vector<8x16xf32>
    tpu.vector_store %arg41[%c0_109, %c0_110], %145 {strides = array<i32>} : memref<8x16xf32, #tpu.memory_space<vmem>>, vector<8x16xf32>,
    return
  }
  func.func @transform_0(%arg0: i32) -> (i32, i32) {
    %c0_i32 = arith.constant 0 : i32
    %c0_i32_0 = arith.constant 0 : i32
    return %arg0, %c0_i32 : i32, i32
  }
  func.func @transform_1(%arg0: i32) -> (i32, i32) {
    %c0_i32 = arith.constant 0 : i32
    %c0_i32_0 = arith.constant 0 : i32
    return %arg0, %c0_i32 : i32, i32
  }
  func.func @transform_2(%arg0: i32) -> (i32, i32) {
    %c0_i32 = arith.constant 0 : i32
    %c0_i32_0 = arith.constant 0 : i32
    %c0_i32_1 = arith.constant 0 : i32
    return %c0_i32, %c0_i32_0 : i32, i32
  }
  func.func @transform_3(%arg0: i32) -> (i32, i32) {
    %c0_i32 = arith.constant 0 : i32
    %c0_i32_0 = arith.constant 0 : i32
    %c0_i32_1 = arith.constant 0 : i32
    return %c0_i32, %c0_i32_0 : i32, i32
  }
  func.func @transform_4(%arg0: i32) -> (i32, i32) {
    %c0_i32 = arith.constant 0 : i32
    %c0_i32_0 = arith.constant 0 : i32
    %c0_i32_1 = arith.constant 0 : i32
    return %c0_i32, %c0_i32_0 : i32, i32
  }
  func.func @transform_5(%arg0: i32) -> (i32, i32) {
    %c0_i32 = arith.constant 0 : i32
    %c0_i32_0 = arith.constant 0 : i32
    %c0_i32_1 = arith.constant 0 : i32
    return %c0_i32, %c0_i32_0 : i32, i32
  }
  func.func @transform_6(%arg0: i32) -> (i32, i32) {
    %c0_i32 = arith.constant 0 : i32
    %c0_i32_0 = arith.constant 0 : i32
    %c0_i32_1 = arith.constant 0 : i32
    return %c0_i32, %c0_i32_0 : i32, i32
  }
  func.func @transform_7(%arg0: i32) -> (i32, i32) {
    %c0_i32 = arith.constant 0 : i32
    %c0_i32_0 = arith.constant 0 : i32
    %c0_i32_1 = arith.constant 0 : i32
    return %c0_i32, %c0_i32_0 : i32, i32
  }
  func.func @transform_8(%arg0: i32) -> (i32, i32) {
    %c0_i32 = arith.constant 0 : i32
    %c0_i32_0 = arith.constant 0 : i32
    %c0_i32_1 = arith.constant 0 : i32
    return %c0_i32, %c0_i32_0 : i32, i32
  }
  func.func @transform_9(%arg0: i32) -> (i32, i32) {
    %c0_i32 = arith.constant 0 : i32
    %c0_i32_0 = arith.constant 0 : i32
    %c0_i32_1 = arith.constant 0 : i32
    return %c0_i32, %c0_i32_0 : i32, i32
  }
  func.func @transform_10(%arg0: i32) -> (i32, i32) {
    %c0_i32 = arith.constant 0 : i32
    %c0_i32_0 = arith.constant 0 : i32
    %c0_i32_1 = arith.constant 0 : i32
    return %c0_i32, %c0_i32_0 : i32, i32
  }
  func.func @transform_11(%arg0: i32) -> (i32, i32) {
    %c0_i32 = arith.constant 0 : i32
    %c0_i32_0 = arith.constant 0 : i32
    %c0_i32_1 = arith.constant 0 : i32
    return %c0_i32, %c0_i32_0 : i32, i32
  }
  func.func @transform_12(%arg0: i32) -> (i32, i32) {
    %c0_i32 = arith.constant 0 : i32
    %c0_i32_0 = arith.constant 0 : i32
    %c0_i32_1 = arith.constant 0 : i32
    return %c0_i32, %c0_i32_0 : i32, i32
  }
  func.func @transform_13(%arg0: i32) -> (i32, i32) {
    %c0_i32 = arith.constant 0 : i32
    %c0_i32_0 = arith.constant 0 : i32
    %c0_i32_1 = arith.constant 0 : i32
    return %c0_i32, %c0_i32_0 : i32, i32
  }
  func.func @transform_14(%arg0: i32) -> (i32, i32) {
    %c0_i32 = arith.constant 0 : i32
    %c0_i32_0 = arith.constant 0 : i32
    %c0_i32_1 = arith.constant 0 : i32
    return %c0_i32, %c0_i32_0 : i32, i32
  }
  func.func @transform_15(%arg0: i32) -> (i32, i32) {
    %c0_i32 = arith.constant 0 : i32
    %c0_i32_0 = arith.constant 0 : i32
    %c0_i32_1 = arith.constant 0 : i32
    return %c0_i32, %c0_i32_0 : i32, i32
  }
  func.func @transform_16(%arg0: i32) -> (i32, i32) {
    %c0_i32 = arith.constant 0 : i32
    %c0_i32_0 = arith.constant 0 : i32
    %c0_i32_1 = arith.constant 0 : i32
    return %c0_i32, %c0_i32_0 : i32, i32
  }
  func.func @transform_17(%arg0: i32) -> (i32, i32) {
    %c0_i32 = arith.constant 0 : i32
    %c0_i32_0 = arith.constant 0 : i32
    %c0_i32_1 = arith.constant 0 : i32
    return %c0_i32, %c0_i32_0 : i32, i32
  }
  func.func @transform_18(%arg0: i32) -> (i32, i32) {
    %c0_i32 = arith.constant 0 : i32
    %c0_i32_0 = arith.constant 0 : i32
    %c0_i32_1 = arith.constant 0 : i32
    return %c0_i32, %c0_i32_0 : i32, i32
  }
  func.func @transform_19(%arg0: i32) -> (i32, i32) {
    %c0_i32 = arith.constant 0 : i32
    %c0_i32_0 = arith.constant 0 : i32
    %c0_i32_1 = arith.constant 0 : i32
    return %c0_i32, %c0_i32_0 : i32, i32
  }
  func.func @transform_20(%arg0: i32) -> (i32, i32) {
    %c0_i32 = arith.constant 0 : i32
    %c0_i32_0 = arith.constant 0 : i32
    %c0_i32_1 = arith.constant 0 : i32
    return %c0_i32, %c0_i32_0 : i32, i32
  }
  func.func @transform_21(%arg0: i32) -> (i32, i32) {
    %c0_i32 = arith.constant 0 : i32
    %c0_i32_0 = arith.constant 0 : i32
    %c0_i32_1 = arith.constant 0 : i32
    return %c0_i32, %c0_i32_0 : i32, i32
  }
  func.func @transform_22(%arg0: i32) -> (i32, i32) {
    %c0_i32 = arith.constant 0 : i32
    %c0_i32_0 = arith.constant 0 : i32
    %c0_i32_1 = arith.constant 0 : i32
    return %c0_i32, %c0_i32_0 : i32, i32
  }
  func.func @transform_23(%arg0: i32) -> (i32, i32) {
    %c0_i32 = arith.constant 0 : i32
    %c0_i32_0 = arith.constant 0 : i32
    %c0_i32_1 = arith.constant 0 : i32
    return %c0_i32, %c0_i32_0 : i32, i32
  }
  func.func @transform_24(%arg0: i32) -> (i32, i32) {
    %c0_i32 = arith.constant 0 : i32
    %c0_i32_0 = arith.constant 0 : i32
    %c0_i32_1 = arith.constant 0 : i32
    return %c0_i32, %c0_i32_0 : i32, i32
  }
  func.func @transform_25(%arg0: i32) -> (i32, i32) {
    %c0_i32 = arith.constant 0 : i32
    %c0_i32_0 = arith.constant 0 : i32
    %c0_i32_1 = arith.constant 0 : i32
    return %c0_i32, %c0_i32_0 : i32, i32
  }
  func.func @transform_26(%arg0: i32) -> (i32, i32) {
    %c0_i32 = arith.constant 0 : i32
    %c0_i32_0 = arith.constant 0 : i32
    %c0_i32_1 = arith.constant 0 : i32
    return %c0_i32, %c0_i32_0 : i32, i32
  }
  func.func @transform_27(%arg0: i32) -> (i32, i32) {
    %c0_i32 = arith.constant 0 : i32
    %c0_i32_0 = arith.constant 0 : i32
    %c0_i32_1 = arith.constant 0 : i32
    return %c0_i32, %c0_i32_0 : i32, i32
  }
  func.func @transform_28(%arg0: i32) -> (i32, i32) {
    %c0_i32 = arith.constant 0 : i32
    %c0_i32_0 = arith.constant 0 : i32
    %c0_i32_1 = arith.constant 0 : i32
    return %c0_i32, %c0_i32_0 : i32, i32
  }
  func.func @transform_29(%arg0: i32) -> (i32, i32) {
    %c0_i32 = arith.constant 0 : i32
    %c0_i32_0 = arith.constant 0 : i32
    %c0_i32_1 = arith.constant 0 : i32
    return %c0_i32, %c0_i32_0 : i32, i32
  }
  func.func @transform_30(%arg0: i32) -> (i32, i32) {
    %c0_i32 = arith.constant 0 : i32
    %c0_i32_0 = arith.constant 0 : i32
    %c0_i32_1 = arith.constant 0 : i32
    return %c0_i32, %c0_i32_0 : i32, i32
  }
  func.func @transform_31(%arg0: i32) -> (i32, i32) {
    %c0_i32 = arith.constant 0 : i32
    %c0_i32_0 = arith.constant 0 : i32
    %c0_i32_1 = arith.constant 0 : i32
    return %c0_i32, %c0_i32_0 : i32, i32
  }
  func.func @transform_32(%arg0: i32) -> (i32, i32) {
    %c0_i32 = arith.constant 0 : i32
    %c0_i32_0 = arith.constant 0 : i32
    %c0_i32_1 = arith.constant 0 : i32
    return %c0_i32, %c0_i32_0 : i32, i32
  }
  func.func @transform_33(%arg0: i32) -> (i32, i32) {
    %c0_i32 = arith.constant 0 : i32
    %c0_i32_0 = arith.constant 0 : i32
    %c0_i32_1 = arith.constant 0 : i32
    return %c0_i32, %c0_i32_0 : i32, i32
  }
  func.func @transform_34(%arg0: i32) -> (i32, i32) {
    %c0_i32 = arith.constant 0 : i32
    %c0_i32_0 = arith.constant 0 : i32
    %c0_i32_1 = arith.constant 0 : i32
    return %c0_i32, %c0_i32_0 : i32, i32
  }
  func.func @transform_35(%arg0: i32) -> (i32, i32) {
    %c0_i32 = arith.constant 0 : i32
    %c0_i32_0 = arith.constant 0 : i32
    %c0_i32_1 = arith.constant 0 : i32
    return %c0_i32, %c0_i32_0 : i32, i32
  }
  func.func @transform_36(%arg0: i32) -> (i32, i32) {
    %c0_i32 = arith.constant 0 : i32
    %c0_i32_0 = arith.constant 0 : i32
    %c0_i32_1 = arith.constant 0 : i32
    return %c0_i32, %c0_i32_0 : i32, i32
  }
  func.func @transform_37(%arg0: i32) -> (i32, i32) {
    %c0_i32 = arith.constant 0 : i32
    %c0_i32_0 = arith.constant 0 : i32
    %c0_i32_1 = arith.constant 0 : i32
    return %c0_i32, %c0_i32_0 : i32, i32
  }
  func.func @transform_38(%arg0: i32) -> (i32, i32) {
    %c0_i32 = arith.constant 0 : i32
    %c0_i32_0 = arith.constant 0 : i32
    %c0_i32_1 = arith.constant 0 : i32
    return %c0_i32, %c0_i32_0 : i32, i32
  }
  func.func @transform_39(%arg0: i32) -> (i32, i32) {
    %c0_i32 = arith.constant 0 : i32
    %c0_i32_0 = arith.constant 0 : i32
    %c0_i32_1 = arith.constant 0 : i32
    return %c0_i32, %c0_i32_0 : i32, i32
  }
  func.func @transform_40(%arg0: i32) -> (i32, i32) {
    %c0_i32 = arith.constant 0 : i32
    %c0_i32_0 = arith.constant 0 : i32
    return %arg0, %c0_i32 : i32, i32
  }
}

</mosaic_0001>

<bundles_post_ra>
// kernel: unet_forward.1
= control target key start
LH: loop header
LB: loop body
LE: loop exit
PB: predicated region body
PF: predicated region fallthrough
CT: control target
= control target key end

     0   :  { %s2740_s6 = smov 1   ;;  %s2741_s10 = smov 2   ;;  %s3217_s0 = inlined_call_operand.smem [shape: u32[41], index: -1, kind: input, shape index: {}] }
   0x1   :  { %s2811_s5 = sld [smem:[%s3217_s0]]   ;;  %s2742_s14 = smov 3  }
   0x2   :  { %s2816_s9 = sld [smem:[%s3217_s0 + %s2740_s6]]   ;;  %s2743_s18 = smov 4  }
   0x3   :  { %s2821_s13 = sld [smem:[%s3217_s0 + %s2741_s10]]   ;;  %s2744_s22 = smov 5  }
   0x4   :  { %s2826_s17 = sld [smem:[%s3217_s0 + %s2742_s14]]   ;;  %s2745_s26 = smov 6  }
   0x5   :  { %s2831_s21 = sld [smem:[%s3217_s0 + %s2743_s18]]   ;;  %s2746_s30 = smov 7  }
   0x6   :  { %s2836_s25 = sld [smem:[%s3217_s0 + %s2744_s22]]   ;;  %s2747_s4 = smov 8  }
   0x7   :  { %3233 = sst [smem:[#allocation39_spill]] %s2811_s5  ;;  %s2748_s10 = smov 9  }
   0x8   :  { %3234 = sst [smem:[#allocation40_spill]] %s2816_s9  ;;  %s2749_s15 = smov 10  }
   0x9   :  { %3235 = sst [smem:[#allocation41_spill]] %s2821_s13  ;;  %s2750_s20 = smov 11  }
   0xa   :  { %3236 = sst [smem:[#allocation42_spill]] %s2826_s17  ;;  %s2752_s1 = smov 13  }
   0xb   :  { %3237 = sst [smem:[#allocation43_spill]] %s2831_s21  ;;  %s2753_s7 = smov 14  }
   0xc   :  { %3238 = sst [smem:[#allocation44_spill]] %s2836_s25  ;;  %s2755_s22 = smov 16  }
   0xd   :  { %s2841_s29 = sld [smem:[%s3217_s0 + %s2745_s26]]   ;;  %s2751_s26 = smov 12  }
   0xe   :  { %s2846_s3 = sld [smem:[%s3217_s0 + %s2746_s30]]   ;;  %s2756_s28 = smov 17  }
   0xf   :  { %s2851_s8 = sld [smem:[%s3217_s0 + %s2747_s4]]  }
  0x10   :  { %s2856_s14 = sld [smem:[%s3217_s0 + %s2748_s10]]  }
  0x11   :  { %s2861_s19 = sld [smem:[%s3217_s0 + %s2749_s15]]   ;;  %s2754_s15 = smov 15  }
  0x12   :  { %s2866_s24 = sld [smem:[%s3217_s0 + %s2750_s20]]  }
  0x13   :  { %3239 = sst [smem:[#allocation45_spill]] %s2841_s29 }
  0x14   :  { %s2871_s30 = sld [smem:[%s3217_s0 + %s2751_s26]]  }
  0x15   :  { %3240 = sst [smem:[#allocation46_spill]] %s2851_s8 }
  0x16   :  { %s2876_s6 = sld [smem:[%s3217_s0 + %s2752_s1]]  }
  0x17   :  { %3241 = sst [smem:[#allocation47_spill]] %s2861_s19 }
  0x18   :  { %s2881_s12 = sld [smem:[%s3217_s0 + %s2753_s7]]   ;;  %s2757_s7 = smov 18  }
  0x19   :  { %s2886_s20 = sld [smem:[%s3217_s0 + %s2754_s15]]   ;;  %s2758_s15 = smov 19  }
  0x1a   :  { %3242 = sst [smem:[#allocation48_spill]] %s2871_s30 }
  0x1b   :  { %s2891_s27 = sld [smem:[%s3217_s0 + %s2755_s22]]   ;;  %s2759_s22 = smov 20  }
  0x1c   :  { %s2896_s4 = sld [smem:[%s3217_s0 + %s2756_s28]]   ;;  %s2760_s28 = smov 21  }
  0x1d   :  { %s2906_s30 = sld [smem:[%s3217_s0 + %s2758_s15]]   ;;  %s2762_s15 = smov 23  }
  0x1e   :  { %3243 = sst [smem:[#allocation49_spill]] %s2881_s12 }
  0x1f   :  { %s2901_s12 = sld [smem:[%s3217_s0 + %s2757_s7]]   ;;  %s2761_s7 = smov 22  }
  0x20   :  { %s2916_s19 = sld [smem:[%s3217_s0 + %s2760_s28]]   ;;  %s2764_s28 = smov 25  }
  0x21   :  { %3244 = sst [smem:[#allocation50_spill]] %s2891_s27 }
  0x22   :  { %s2911_s27 = sld [smem:[%s3217_s0 + %s2759_s22]]   ;;  %s2763_s22 = smov 24  }
  0x23   :  { %s2926_s5 = sld [smem:[%s3217_s0 + %s2762_s15]]   ;;  %s2766_s15 = smov 27  }
  0x24   :  { %s2936_s25 = sld [smem:[%s3217_s0 + %s2764_s28]]   ;;  %s2768_s28 = smov 29  }
  0x25   :  { %3245 = sst [smem:[#allocation51_spill]] %s2901_s12 }
  0x26   :  { %s2921_s12 = sld [smem:[%s3217_s0 + %s2761_s7]]   ;;  %s2765_s7 = smov 26  }
  0x27   :  { %s2946_s8 = sld [smem:[%s3217_s0 + %s2766_s15]]   ;;  %s2770_s15 = smov 31  }
  0x28   :  { %3246 = sst [smem:[#allocation52_spill]] %s2911_s27 }
  0x29   :  { %s2931_s27 = sld [smem:[%s3217_s0 + %s2763_s22]]   ;;  %s2767_s22 = smov 28  }
  0x2a   :  { %s2956_s29 = sld [smem:[%s3217_s0 + %s2768_s28]]   ;;  %s2772_s28 = smov 33  }
  0x2b   :  { %s2966_s17 = sld [smem:[%s3217_s0 + %s2770_s15]]   ;;  %s2774_s15 = smov 35  }
  0x2c   :  { %3247 = sst [smem:[#allocation53_spill]] %s2921_s12 }
  0x2d   :  { %s2941_s12 = sld [smem:[%s3217_s0 + %s2765_s7]]   ;;  %s2769_s7 = smov 30  }
  0x2e   :  { %s2976_s13 = sld [smem:[%s3217_s0 + %s2772_s28]]   ;;  %s2776_s28 = smov 37  }
  0x2f   :  { %3248 = sst [smem:[#allocation54_spill]] %s2931_s27 }
  0x30   :  { %s2951_s27 = sld [smem:[%s3217_s0 + %s2767_s22]]   ;;  %s2771_s22 = smov 32  }
  0x31   :  { %s2986_s21 = sld [smem:[%s3217_s0 + %s2774_s15]]   ;;  %s2778_s15 = smov 39  }
  0x32   :  { %s2996_s9 = sld [smem:[%s3217_s0 + %s2776_s28]]  }
  0x33   :  { %3249 = sst [smem:[#allocation55_spill]] %s2941_s12 }
  0x34   :  { %s2961_s12 = sld [smem:[%s3217_s0 + %s2769_s7]]   ;;  %s2773_s7 = smov 34  }
  0x36   :  { %3250 = sst [smem:[#allocation56_spill]] %s2951_s27 }
  0x37   :  { %s2971_s27 = sld [smem:[%s3217_s0 + %s2771_s22]]   ;;  %s2775_s22 = smov 36  }
  0x38   :  { %3254 = sst [smem:[#allocation60_spill]] %s2986_s21 }
  0x39   :  { %s3006_s21 = sld [smem:[%s3217_s0 + %s2778_s15]]  }
  0x3a   :  { %3251 = sst [smem:[#allocation57_spill]] %s2961_s12 }
  0x3b   :  { %s2981_s12 = sld [smem:[%s3217_s0 + %s2773_s7]]   ;;  %s2777_s7 = smov 38  }
  0x3d   :  { %3252 = sst [smem:[#allocation58_spill]] %s2971_s27 }
  0x3e   :  { %s2991_s27 = sld [smem:[%s3217_s0 + %s2775_s22]]   ;;  %s2779_s22 = smov 40  }
  0x41   :  { %3253 = sst [smem:[#allocation59_spill]] %s2981_s12 }
  0x42   :  { %s3001_s12 = sld [smem:[%s3217_s0 + %s2777_s7]]  }
  0x44   :  { %3255 = sst [smem:[#allocation61_spill]] %s2991_s27 }
  0x45   :  { %s3011_s27 = sld [smem:[%s3217_s0 + %s2779_s22]]  }
  0x46   :  { %86 = vsyncpa [#allocation3], 0 }
  0x47   :  { %87 = vsyncpa [#allocation6], 0 }
  0x48   :  { %88 = vsyncpa [#allocation9], 0 }
  0x49   :  { %89 = vsyncpa [#allocation12], 0 }
  0x4a   :  { %90 = vsyncpa [#allocation15], 0 }
  0x4b   :  { %91 = vsyncpa [#allocation18], 0 }
  0x4c   :  { %92 = vsyncpa [#allocation21], 0 }
  0x4d   :  { %93 = vsyncpa [#allocation24], 0 }
  0x4e   :  { %94 = vsyncpa [#allocation27], 0 }
  0x4f   :  { %95 = vsyncpa [#allocation4], 0  ;;  %s2780_s28 = smov [#allocation5]   ;;  %s2781_s2 = smov [#allocation8]  }
  0x50   :  { %s128_s1 = sshll.u32 %s2780_s28, 4  ;;  %s152_s7 = sshll.u32 %s2781_s2, 4  ;;  %s129_s1 = int_to_ptr.vmem [resolvable:$true] %s128_s1  ;;  %s153_s7 = int_to_ptr.vmem [resolvable:$true] %s152_s7 }
  0x51   :  { %s2388_s10 = scalar_lea.vmem %s129_s1, 16  ;;  %s2392_s0 = scalar_lea.vmem %s129_s1, 32 }
  0x52   :  { %p2389_p0 = scmp.ne.s32.totalorder %s129_s1, %s2388_s10  ;;  %p2393_p1 = scmp.lt.s32.totalorder %s129_s1, %s129_s1 }
  0x53   :  { %p2394_p2 = scmp.lt.s32.totalorder %s2392_s0, %s2388_s10 }
  0x55   :  { %p2395_p3 = por %p2394_p2, %p2393_p1 }
  0x57   :  { %p2396_p4 = pnand %p2395_p3, %p2389_p0 }
  0x59   :  { %2399 = shalt.err (!%p2396_p4)
}
  0x5a   :  { %131 = dma.hbm_to_vmem [thread:$0]  %s2856_s14, 16, %s129_s1, [#allocation6]  }
  0x5b   :  { %s2408_s11 = scalar_lea.vmem %s153_s7, 16  ;;  %s2412_s15 = scalar_lea.vmem %s153_s7, 32 }
  0x5c   :  { %p2409_p5 = scmp.ne.s32.totalorder %s153_s7, %s2408_s11  ;;  %p2413_p6 = scmp.lt.s32.totalorder %s153_s7, %s153_s7 }
  0x5d   :  { %p2414_p7 = scmp.lt.s32.totalorder %s2412_s15, %s2408_s11 }
  0x5f   :  { %p2415_p8 = por %p2414_p7, %p2413_p6 }
  0x61   :  { %p2416_p9 = pnand %p2415_p8, %p2409_p5 }
  0x63   :  { %2419 = shalt.err (!%p2416_p9)
}
  0x64   :  { %155 = dma.hbm_to_vmem [thread:$0]  %s2876_s6, 16, %s153_s7, [#allocation9]  }
  0x65   :  { %s2782_s16 = smov [#allocation11]   ;;  %s2783_s22 = smov [#allocation14]  }
  0x66   :  { %s176_s18 = sshll.u32 %s2782_s16, 4  ;;  %s200_s23 = sshll.u32 %s2783_s22, 4  ;;  %s177_s18 = int_to_ptr.vmem [resolvable:$true] %s176_s18  ;;  %s201_s23 = int_to_ptr.vmem [resolvable:$true] %s200_s23 }
  0x67   :  { %s2428_s26 = scalar_lea.vmem %s177_s18, 16  ;;  %s2432_s28 = scalar_lea.vmem %s177_s18, 32 }
  0x68   :  { %p2429_p10 = scmp.ne.s32.totalorder %s177_s18, %s2428_s26  ;;  %p2433_p11 = scmp.lt.s32.totalorder %s177_s18, %s177_s18 }
  0x69   :  { %p2434_p12 = scmp.lt.s32.totalorder %s2432_s28, %s2428_s26 }
  0x6b   :  { %p2435_p13 = por %p2434_p12, %p2433_p11 }
  0x6d   :  { %p2436_p0 = pnand %p2435_p13, %p2429_p10 }
  0x6f   :  { %2439 = shalt.err (!%p2436_p0)
}
  0x70   :  { %179 = dma.hbm_to_vmem [thread:$0]  %s2896_s4, 16, %s177_s18, [#allocation12]  }
  0x71   :  { %s2448_s14 = scalar_lea.vmem %s201_s23, 16  ;;  %s2452_s1 = scalar_lea.vmem %s201_s23, 32 }
  0x72   :  { %p2449_p1 = scmp.ne.s32.totalorder %s201_s23, %s2448_s14  ;;  %p2453_p2 = scmp.lt.s32.totalorder %s201_s23, %s201_s23 }
  0x73   :  { %p2454_p3 = scmp.lt.s32.totalorder %s2452_s1, %s2448_s14 }
  0x75   :  { %p2455_p4 = por %p2454_p3, %p2453_p2 }
  0x77   :  { %p2456_p5 = pnand %p2455_p4, %p2449_p1 }
  0x79   :  { %2459 = shalt.err (!%p2456_p5)
}
  0x7a   :  { %203 = dma.hbm_to_vmem [thread:$0]  %s2916_s19, 16, %s201_s23, [#allocation15]  }
  0x7b   :  { %s2784_s6 = smov [#allocation17]   ;;  %s2785_s7 = smov [#allocation20]  }
  0x7c   :  { %s224_s2 = sshll.u32 %s2784_s6, 4  ;;  %s248_s10 = sshll.u32 %s2785_s7, 4  ;;  %s225_s2 = int_to_ptr.vmem [resolvable:$true] %s224_s2  ;;  %s249_s10 = int_to_ptr.vmem [resolvable:$true] %s248_s10 }
  0x7d   :  { %s2468_s0 = scalar_lea.vmem %s225_s2, 16  ;;  %s2472_s11 = scalar_lea.vmem %s225_s2, 32 }
  0x7e   :  { %p2469_p6 = scmp.ne.s32.totalorder %s225_s2, %s2468_s0  ;;  %p2473_p7 = scmp.lt.s32.totalorder %s225_s2, %s225_s2 }
  0x7f   :  { %p2474_p8 = scmp.lt.s32.totalorder %s2472_s11, %s2468_s0 }
  0x81   :  { %p2475_p9 = por %p2474_p8, %p2473_p7 }
  0x83   :  { %p2476_p10 = pnand %p2475_p9, %p2469_p6 }
  0x85   :  { %2479 = shalt.err (!%p2476_p10)
}
  0x86   :  { %227 = dma.hbm_to_vmem [thread:$0]  %s2936_s25, 16, %s225_s2, [#allocation18]  }
  0x87   :  { %s2488_s4 = scalar_lea.vmem %s249_s10, 16  ;;  %s2492_s15 = scalar_lea.vmem %s249_s10, 32 }
  0x88   :  { %p2489_p11 = scmp.ne.s32.totalorder %s249_s10, %s2488_s4  ;;  %p2493_p12 = scmp.lt.s32.totalorder %s249_s10, %s249_s10 }
  0x89   :  { %p2494_p13 = scmp.lt.s32.totalorder %s2492_s15, %s2488_s4 }
  0x8b   :  { %p2495_p0 = por %p2494_p13, %p2493_p12 }
  0x8d   :  { %p2496_p1 = pnand %p2495_p0, %p2489_p11 }
  0x8f   :  { %2499 = shalt.err (!%p2496_p1)
}
  0x90   :  { %251 = dma.hbm_to_vmem [thread:$0]  %s2956_s29, 16, %s249_s10, [#allocation21]  }
  0x91   :  { %s2786_s19 = smov [#allocation23]   ;;  %s2787_s18 = smov [#allocation2]  }
  0x92   :  { %s272_s16 = sshll.u32 %s2786_s19, 4  ;;  %s116_s22 = sshll.u32 %s2787_s18, 4  ;;  %s273_s16 = int_to_ptr.vmem [resolvable:$true] %s272_s16  ;;  %s117_s22 = int_to_ptr.vmem [resolvable:$true] %s116_s22 }
  0x93   :  { %s2508_s23 = scalar_lea.vmem %s273_s16, 16  ;;  %s2512_s26 = scalar_lea.vmem %s273_s16, 32 }
  0x94   :  { %p2509_p2 = scmp.ne.s32.totalorder %s273_s16, %s2508_s23  ;;  %p2513_p3 = scmp.lt.s32.totalorder %s273_s16, %s273_s16 }
  0x95   :  { %p2514_p4 = scmp.lt.s32.totalorder %s2512_s26, %s2508_s23 }
  0x97   :  { %p2515_p5 = por %p2514_p4, %p2513_p3 }
  0x99   :  { %p2516_p6 = pnand %p2515_p5, %p2509_p2 }
  0x9b   :  { %2519 = shalt.err (!%p2516_p6)
}
  0x9c   :  { %275 = dma.hbm_to_vmem [thread:$0]  %s2976_s13, 16, %s273_s16, [#allocation24]  }
  0x9d   :  { %s2528_s25 = scalar_lea.vmem %s117_s22, 16  ;;  %s2532_s28 = scalar_lea.vmem %s117_s22, 32 }
  0x9e   :  { %p2529_p7 = scmp.ne.s32.totalorder %s117_s22, %s2528_s25  ;;  %p2533_p8 = scmp.lt.s32.totalorder %s117_s22, %s117_s22 }
  0x9f   :  { %p2534_p9 = scmp.lt.s32.totalorder %s2532_s28, %s2528_s25 }
  0xa1   :  { %p2535_p10 = por %p2534_p9, %p2533_p8 }
  0xa3   :  { %p2536_p11 = pnand %p2535_p10, %p2529_p7 }
  0xa5   :  { %2539 = shalt.err (!%p2536_p11)
}
  0xa6   :  { %119 = dma.hbm_to_vmem [thread:$0]  %s2846_s3, 16, %s117_s22, [#allocation3]  }
  0xa7   :  { %s2788_s29 = smov [#allocation7]   ;;  %s2789_s1 = smov [#allocation10]  }
  0xa8   :  { %s140_s14 = sshll.u32 %s2788_s29, 4  ;;  %s164_s6 = sshll.u32 %s2789_s1, 4  ;;  %s141_s14 = int_to_ptr.vmem [resolvable:$true] %s140_s14  ;;  %s165_s6 = int_to_ptr.vmem [resolvable:$true] %s164_s6 }
  0xa9   :  { %s2548_s2 = scalar_lea.vmem %s141_s14, 16  ;;  %s2552_s7 = scalar_lea.vmem %s141_s14, 32 }
  0xaa   :  { %p2549_p12 = scmp.ne.s32.totalorder %s141_s14, %s2548_s2  ;;  %p2553_p13 = scmp.lt.s32.totalorder %s141_s14, %s141_s14 }
  0xab   :  { %p2554_p0 = scmp.lt.s32.totalorder %s2552_s7, %s2548_s2 }
  0xad   :  { %p2555_p1 = por %p2554_p0, %p2553_p13 }
  0xaf   :  { %p2556_p2 = pnand %p2555_p1, %p2549_p12 }
  0xb1   :  { %2559 = shalt.err (!%p2556_p2)
}
  0xb2   :  { %143 = dma.hbm_to_vmem [thread:$0]  %s2866_s24, 16, %s141_s14, [#allocation6]  }
  0xb3   :  { %s2568_s13 = scalar_lea.vmem %s165_s6, 16  ;;  %s2572_s10 = scalar_lea.vmem %s165_s6, 32 }
  0xb4   :  { %p2569_p3 = scmp.ne.s32.totalorder %s165_s6, %s2568_s13  ;;  %p2573_p4 = scmp.lt.s32.totalorder %s165_s6, %s165_s6 }
  0xb5   :  { %p2574_p5 = scmp.lt.s32.totalorder %s2572_s10, %s2568_s13 }
  0xb7   :  { %p2575_p6 = por %p2574_p5, %p2573_p4 }
  0xb9   :  { %p2576_p7 = pnand %p2575_p6, %p2569_p3 }
  0xbb   :  { %2579 = shalt.err (!%p2576_p7)
}
  0xbc   :  { %167 = dma.hbm_to_vmem [thread:$0]  %s2886_s20, 16, %s165_s6, [#allocation9]  }
  0xbd   :  { %s2790_s3 = smov [#allocation13]   ;;  %s2791_s11 = smov [#allocation16]  }
  0xbe   :  { %s188_s0 = sshll.u32 %s2790_s3, 4  ;;  %s212_s4 = sshll.u32 %s2791_s11, 4  ;;  %s189_s0 = int_to_ptr.vmem [resolvable:$true] %s188_s0  ;;  %s213_s4 = int_to_ptr.vmem [resolvable:$true] %s212_s4 }
  0xbf   :  { %s2588_s15 = scalar_lea.vmem %s189_s0, 16  ;;  %s2592_s19 = scalar_lea.vmem %s189_s0, 32 }
  0xc0   :  { %p2589_p8 = scmp.ne.s32.totalorder %s189_s0, %s2588_s15  ;;  %p2593_p9 = scmp.lt.s32.totalorder %s189_s0, %s189_s0 }
  0xc1   :  { %p2594_p10 = scmp.lt.s32.totalorder %s2592_s19, %s2588_s15 }
  0xc3   :  { %p2595_p11 = por %p2594_p10, %p2593_p9 }
  0xc5   :  { %p2596_p12 = pnand %p2595_p11, %p2589_p8 }
  0xc7   :  { %2599 = shalt.err (!%p2596_p12)
}
  0xc8   :  { %191 = dma.hbm_to_vmem [thread:$0]  %s2906_s30, 16, %s189_s0, [#allocation12]  }
  0xc9   :  { %s2608_s24 = scalar_lea.vmem %s213_s4, 16  ;;  %s2612_s16 = scalar_lea.vmem %s213_s4, 32 }
  0xca   :  { %p2609_p13 = scmp.ne.s32.totalorder %s213_s4, %s2608_s24  ;;  %p2613_p0 = scmp.lt.s32.totalorder %s213_s4, %s213_s4 }
  0xcb   :  { %p2614_p1 = scmp.lt.s32.totalorder %s2612_s16, %s2608_s24 }
  0xcd   :  { %p2615_p2 = por %p2614_p1, %p2613_p0 }
  0xcf   :  { %p2616_p3 = pnand %p2615_p2, %p2609_p13 }
  0xd1   :  { %2619 = shalt.err (!%p2616_p3)
}
  0xd2   :  { %215 = dma.hbm_to_vmem [thread:$0]  %s2926_s5, 16, %s213_s4, [#allocation15]  }
  0xd3   :  { %s2792_s20 = smov [#allocation19]   ;;  %s2793_s22 = smov [#allocation22]  }
  0xd4   :  { %s236_s18 = sshll.u32 %s2792_s20, 4  ;;  %s260_s23 = sshll.u32 %s2793_s22, 4  ;;  %s237_s18 = int_to_ptr.vmem [resolvable:$true] %s236_s18  ;;  %s261_s23 = int_to_ptr.vmem [resolvable:$true] %s260_s23 }
  0xd5   :  { %s2628_s26 = scalar_lea.vmem %s237_s18, 16  ;;  %s2632_s25 = scalar_lea.vmem %s237_s18, 32 }
  0xd6   :  { %p2629_p4 = scmp.ne.s32.totalorder %s237_s18, %s2628_s26  ;;  %p2633_p5 = scmp.lt.s32.totalorder %s237_s18, %s237_s18 }
  0xd7   :  { %p2634_p6 = scmp.lt.s32.totalorder %s2632_s25, %s2628_s26 }
  0xd9   :  { %p2635_p7 = por %p2634_p6, %p2633_p5 }
  0xdb   :  { %p2636_p8 = pnand %p2635_p7, %p2629_p4 }
  0xdd   :  { %2639 = shalt.err (!%p2636_p8)
}
  0xde   :  { %239 = dma.hbm_to_vmem [thread:$0]  %s2946_s8, 16, %s237_s18, [#allocation18]  }
  0xdf   :  { %s2648_s30 = scalar_lea.vmem %s261_s23, 16  ;;  %s2652_s28 = scalar_lea.vmem %s261_s23, 32 }
  0xe0   :  { %p2649_p9 = scmp.ne.s32.totalorder %s261_s23, %s2648_s30  ;;  %p2653_p10 = scmp.lt.s32.totalorder %s261_s23, %s261_s23 }
  0xe1   :  { %p2654_p11 = scmp.lt.s32.totalorder %s2652_s28, %s2648_s30 }
  0xe3   :  { %p2655_p12 = por %p2654_p11, %p2653_p10 }
  0xe5   :  { %p2656_p13 = pnand %p2655_p12, %p2649_p9 }
  0xe7   :  { %2659 = shalt.err (!%p2656_p13)
}
  0xe8   :  { %263 = dma.hbm_to_vmem [thread:$0]  %s2966_s17, 16, %s261_s23, [#allocation21]  }
  0xe9   :  { %s2794_s5 = smov [#allocation25]   ;;  %s2795_s14 = smov [#allocation26]  }
  0xea   :  { %s284_s29 = sshll.u32 %s2794_s5, 4  ;;  %s293_s1 = sshll.u32 %s2795_s14, 4  ;;  %s285_s29 = int_to_ptr.vmem [resolvable:$true] %s284_s29  ;;  %s294_s1 = int_to_ptr.vmem [resolvable:$true] %s293_s1 }
  0xeb   :  { %s2668_s6 = scalar_lea.vmem %s285_s29, 16  ;;  %s2672_s2 = scalar_lea.vmem %s285_s29, 32 }
  0xec   :  { %p2669_p0 = scmp.ne.s32.totalorder %s285_s29, %s2668_s6  ;;  %p2673_p1 = scmp.lt.s32.totalorder %s285_s29, %s285_s29 }
  0xed   :  { %p2674_p2 = scmp.lt.s32.totalorder %s2672_s2, %s2668_s6 }
  0xef   :  { %p2675_p3 = por %p2674_p2, %p2673_p1 }
  0xf1   :  { %p2676_p4 = pnand %p2675_p3, %p2669_p0 }
  0xf3   :  { %2679 = shalt.err (!%p2676_p4)
}
  0xf4   :  { %s3256_s8 = sld [smem:[#allocation60_spill]]  ;;  %s2688_s7 = scalar_lea.vmem %s294_s1, 128 }
  0xf5   :  { %p2689_p5 = scmp.ne.s32.totalorder %s294_s1, %s2688_s7  ;;  %p2693_p6 = scmp.lt.s32.totalorder %s294_s1, %s294_s1 }
  0xf6   :  { %p2694_p7 = scmp.lt.s32.totalorder %s2688_s7, %s2688_s7 }
  0xf8   :  { %p2695_p8 = por %p2694_p7, %p2693_p6 }
  0xfa   :  { %287 = dma.hbm_to_vmem [thread:$0]  %s3256_s8, 16, %s285_s29, [#allocation24]  }
  0xfb   :  { %p2696_p9 = pnand %p2695_p8, %p2689_p5 }
  0xfd   :  { %2699 = shalt.err (!%p2696_p9)
}
  0xfe   :  { %s2796_s17 = smov 64   ;;  %s3257_s13 = sld [smem:[#allocation61_spill]] }
  0xff   :  { %s2797_s10 = smov 4  }
 0x104   :  { %299 = dma.hbm_to_vmem [thread:$0]  %s3257_s13, 128, %s294_s1, [#allocation27], %s2796_s17, %s2796_s17, %s2797_s10  }
 0x105   :  { %2720 = dma.done.wait [#allocation3], 16  }
 0x106   :  { %2721 = vsyncadd [#allocation3], 4294967280 }
 0x107   :  { %2722 = dma.done.wait [#allocation6], 32  }
 0x108   :  { %2723 = vsyncadd [#allocation6], 4294967264 }
 0x109   :  { %2724 = dma.done.wait [#allocation9], 32  }
 0x10a   :  { %2725 = vsyncadd [#allocation9], 4294967264 }
 0x10b   :  { %2726 = dma.done.wait [#allocation12], 32  }
 0x10c   :  { %2727 = vsyncadd [#allocation12], 4294967264 }
 0x10d   :  { %2728 = dma.done.wait [#allocation15], 32  }
 0x10e   :  { %2729 = vsyncadd [#allocation15], 4294967264 }
 0x10f   :  { %2730 = dma.done.wait [#allocation18], 32  }
 0x110   :  { %2731 = vsyncadd [#allocation18], 4294967264 }
 0x111   :  { %2732 = dma.done.wait [#allocation21], 32  }
 0x112   :  { %2733 = vsyncadd [#allocation21], 4294967264 }
 0x113   :  { %2734 = dma.done.wait [#allocation24], 32  }
 0x114   :  { %2735 = vsyncadd [#allocation24], 4294967264 }
 0x115   :  { %2736 = dma.done.wait [#allocation27], 128  }
 0x116   :  { %2737 = vsyncadd [#allocation27], 4294967168  ;;  %s3258_s3 = sld [smem:[#allocation40_spill]]  ;;  %v2798_v0 = vmov 0   ;;  %v2799_v2 = vmov 0.0   ;;  %vm2800_vm0 = vmmov 0   ;;  %v364_v4 = vlaneseq }
 0x117   :  { %s3259_s0 = sld [smem:[#allocation43_spill]]  ;;  %2315 = vset.pattern.permute.xlu0 %v2798_v0  ;;  %2052 = vmatprep.subr.bf16.mxu0 %v2799_v2  ;;  %vm394_vm1 = vcmask 130048   ;;  %s2801_s20 = smov 16   ;;  %vm467_vm2 = vcmask 261120   ;;  %v1876_v30 = vld [vmem:[#allocation2] ss:$0 sm:$0xff] }
 0x118   :  { %s3260_s11 = sld [smem:[#allocation41_spill]]  ;;  %2058 = vmatprep.subr.bf16.mxu1 %v2799_v2  ;;  %2054 = vmatprep.mubr.msk.bf16.mxu0 %vm2800_vm0, %v2799_v2  ;;  %v365_v5 = vshrl.u32 %v364_v4, 7  ;;  %v1880_v42 = vld [vmem:[#allocation5] ss:$0 sm:$0xff]  ;;  %v1884_v57 = vld [vmem:[#allocation7] ss:$0 sm:$0xff] }
 0x119   :  { %s3261_s4 = sld [smem:[#allocation42_spill]]  ;;  %2062 = vmatprep.mubr.msk.bf16.mxu1 %vm2800_vm0, %v2799_v2  ;;  %vm689_vm3 = vcmask 523264  }
 0x11a   :  { %s3262_s15 = sld [smem:[#allocation45_spill]]  ;;  %v366_v8 = vsub.s32 0, %v365_v5 }
 0x11b   :  { %s3263_s19 = sld [smem:[#allocation46_spill]] }
 0x11c   :  { %v356_v1 = vld [vmem:[%s3258_s3] sm:$0xff]  ;;  %s3264_s24 = sld [smem:[#allocation44_spill]] }
 0x11d   :  { %361 = vperm.xlu0 %2315, %v356_v1   ;;  %v2316_v3 = vld [vmem:[%s3259_s0] sm:$0xff]   ;;  %s3265_s16 = sld [smem:[#allocation39_spill]] }
 0x11e   :  { %2053 = vmatpush3.bf16.msra.mxu0 %v2316_v3  ;;  %v357_v6 = vld [vmem:[%s3260_s11] sm:$0x1]  ;;  %s3266_s18 = sld [smem:[#allocation47_spill]] }
 0x11f   :  { %2066 = vmatprep.subr.bf16.mxu0 %v2799_v2  ;;  %v358_v7 = vunpack.c.l.bf16 %v357_v6  ;;  %v1872_v10 = vld [vmem:[%s3261_s4] ss:$0 sm:$0xff]  ;;  %s3267_s22 = sld [smem:[#allocation48_spill]] }
 0x120   :  { %v2317_v16 = vld [vmem:[%s3262_s15 + $0x8] sm:$0xff]   ;;  %v2318_v17 = vld [vmem:[%s3262_s15] sm:$0xff]   ;;  %s3268_s23 = sld [smem:[#allocation49_spill]] }
 0x121   :  { %v367_v9 = vrot.slane %v358_v7, %v366_v8  ;;  %2059 = vmatpush3.bf16.msra.mxu1 %v2317_v16  ;;  %v2319_v18 = vld [vmem:[%s3263_s19 + $0x8] sm:$0xff]   ;;  %v2320_v29 = vld [vmem:[%s3263_s19] sm:$0xff]   ;;  %s3269_s26 = sld [smem:[#allocation50_spill]] }
 0x122   :  { %2060 = vmatprep.subr.bf16.mxu1 %v2799_v2  ;;  %v1873_v19 = vld [vmem:[%s3264_s24] ss:$0 sm:$0xff]  ;;  %s3270_s25 = sld [smem:[#allocation51_spill]] }
 0x123   :  { %v355_v25 = vld [vmem:[%s3265_s16] sm:$0xff]  ;;  %s3271_s30 = sld [smem:[#allocation52_spill]] }
 0x124   :  { %v2321_v38 = vld [vmem:[%s3266_s18 + $0x8] sm:$0xff]   ;;  %v2322_v39 = vld [vmem:[%s3266_s18] sm:$0xff]   ;;  %s3272_s28 = sld [smem:[#allocation53_spill]] }
 0x125   :  { %2061 = vmatpush3.bf16.msra.mxu1 %v2318_v17  ;;  %v2325_v40 = vld [vmem:[%s3267_s22 + $0x18] sm:$0xff]   ;;  %v2326_v41 = vld [vmem:[%s3267_s22 + $0x10] sm:$0xff]   ;;  %v2327_v53 = vld [vmem:[%s3267_s22 + $0x8] sm:$0xff]   ;;  %s3273_s5 = sld [smem:[#allocation54_spill]] }
 0x126   :  { %2074 = vmatprep.subr.bf16.mxu1 %v2799_v2  ;;  %v2323_v50 = vld [vmem:[%s3268_s23 + $0x8] sm:$0xff]   ;;  %v2324_v52 = vld [vmem:[%s3268_s23] sm:$0xff]   ;;  %s3274_s29 = sld [smem:[#allocation55_spill]] }
 0x127   :  { %v2328_v54 = vld [vmem:[%s3267_s22] sm:$0xff]   ;;  %v2329_v55 = vld [vmem:[%s3269_s26 + $0x18] sm:$0xff]   ;;  %v2330_v56 = vld [vmem:[%s3269_s26 + $0x10] sm:$0xff]   ;;  %s3275_s14 = sld [smem:[#allocation56_spill]] }
 0x128   :  { %v2331_v6 = vld [vmem:[%s3269_s26 + $0x8] sm:$0xff]   ;;  %v2332_v7 = vld [vmem:[%s3269_s26] sm:$0xff]   ;;  %v2337_v8 = vld [vmem:[%s3270_s25 + $0x38] sm:$0xff]   ;;  %s3276_s1 = sld [smem:[#allocation58_spill]] }
 0x129   :  { %s3277_s6 = sld [smem:[#allocation57_spill]] }
 0x12a   :  { %s3278_s2 = sld [smem:[#allocation59_spill]] }
 0x198   :  { %v362_v11 = vpop.permute.xlu0 %361 }
 0x199   :  { %v368_v12 = vmul.f32 %v367_v9, %v362_v11  ;;  %v2338_v9 = vld [vmem:[%s3270_s25 + $0x30] sm:$0xff]   ;;  %v2340_v11 = vld [vmem:[%s3270_s25 + $0x20] sm:$0xff]  }
 0x19b   :  { %v376_v13 = vadd.f32 %v1872_v10, %v368_v12  ;;  %v2339_v10 = vld [vmem:[%s3270_s25 + $0x28] sm:$0xff]   ;;  %v2341_v12 = vld [vmem:[%s3270_s25 + $0x18] sm:$0xff]  }
 0x19d   :  { %v377_v14 = vmax.f32 %v376_v13, 0.0  ;;  %v2342_v13 = vld [vmem:[%s3270_s25 + $0x10] sm:$0xff]  }
 0x19f   :  { %v378_v15 = vpack.c.bf16 %v377_v14, %v377_v14  ;;  %v1888_v14 = vld [vmem:[#allocation8] ss:$0 sm:$0xff] }
 0x1a1   :  { %2055 = vmatmul.mubr.msk.bf16.vlgmr.msra.gmra.mxu0 %vm394_vm1, %v378_v15  ;;  %v1894_v15 = vld [vmem:[#allocation10] ss:$0 sm:$0xff] }
 0x1a2   :  { %2070 = vmatprep.mubr.msk.bf16.mxu0 %vm2800_vm0, %v2799_v2  ;;  %2067 = vmatpush3.bf16.msra.mxu0 %v2319_v18 }
 0x1a3   :  { %2068 = vmatprep.subr.bf16.mxu0 %v2799_v2 }
 0x1a6   :  { %2069 = vmatpush3.bf16.msra.mxu0 %v2320_v29  ;;  %v2343_v29 = vld [vmem:[%s3270_s25 + $0x8] sm:$0xff]  }
 0x1a7   :  { %2082 = vmatprep.subr.bf16.mxu0 %v2799_v2 }
 0x261   :  { %v432_v20 = vpop.f32.mrf.mxu0 }
 0x262   :  { %v433_v21 = vadd.f32 %v1873_v19, %v432_v20 }
 0x263   :  { %v2056_v22 = vpop.f32.mrf.mxu0 }
 0x264   :  { %439 = vrot.lane.b32.xlu0 %v433_v21, %s2801_s20 }
 0x265   :  { %v435_v23 = vpop.f32.mrf.mxu0 }
 0x267   :  { %v2057_v24 = vpop.f32.mrf.mxu0 }
 0x268   :  { %v2333_v24 = vld [vmem:[%s3271_s30 + $0x18] sm:$0xff]  }
 0x2d6   :  { %v440_v26 = vpop.permute.xlu0 %439 }
 0x2d7   :  { %v442_v27 = vsel %vm394_vm1, %v355_v25, %v440_v26  ;;  %v2334_v26 = vld [vmem:[%s3271_s30 + $0x10] sm:$0xff]  }
 0x2d8   :  { %v443_v28 = vpack.c.bf16 %v442_v27, %v442_v27 }
 0x2da   :  { %2063 = vmatmul.mubr.msk.bf16.vlgmr.msra.gmra.mxu1 %vm467_vm2, %v443_v28  ;;  %v2336_v28 = vld [vmem:[%s3271_s30] sm:$0xff]  }
 0x2db   :  { %2078 = vmatprep.mubr.msk.bf16.mxu1 %vm2800_vm0, %v2799_v2  ;;  %2075 = vmatpush3.bf16.msra.mxu1 %v2321_v38 }
 0x2dc   :  { %2076 = vmatprep.subr.bf16.mxu1 %v2799_v2 }
 0x2df   :  { %2077 = vmatpush3.bf16.msra.mxu1 %v2322_v39 }
 0x2e0   :  { %2094 = vmatprep.subr.bf16.mxu1 %v2799_v2 }
 0x39a   :  { %v505_v31 = vpop.f32.mrf.mxu1 }
 0x39b   :  { %v506_v32 = vadd.f32 %v1876_v30, %v505_v31  ;;  %v2344_v30 = vld [vmem:[%s3270_s25] sm:$0xff]   ;;  %v2345_v31 = vld [vmem:[%s3272_s28 + $0x38] sm:$0xff]  }
 0x39c   :  { %v2064_v33 = vpop.f32.mrf.mxu1 }
 0x39d   :  { %v511_v34 = vmax.f32 %v506_v32, 0.0  ;;  %v2346_v32 = vld [vmem:[%s3272_s28 + $0x30] sm:$0xff]   ;;  %v2347_v33 = vld [vmem:[%s3272_s28 + $0x28] sm:$0xff]  }
 0x39e   :  { %v508_v35 = vpop.f32.mrf.mxu1 }
 0x39f   :  { %v512_v36 = vpack.c.bf16 %v511_v34, %v511_v34  ;;  %v2348_v34 = vld [vmem:[%s3272_s28 + $0x20] sm:$0xff]   ;;  %v2349_v35 = vld [vmem:[%s3272_s28 + $0x18] sm:$0xff]  }
 0x3a0   :  { %v2065_v37 = vpop.f32.mrf.mxu1 }
 0x3a1   :  { %2071 = vmatmul.mubr.msk.bf16.vlgmr.msra.gmra.mxu0 %vm467_vm2, %v512_v36  ;;  %v2350_v36 = vld [vmem:[%s3272_s28 + $0x10] sm:$0xff]   ;;  %v1898_v37 = vld [vmem:[#allocation11] ss:$0 sm:$0xff] }
 0x3a2   :  { %2090 = vmatprep.mubr.msk.bf16.mxu0 %vm2800_vm0, %v2799_v2  ;;  %2083 = vmatpush3.bf16.msra.mxu0 %v2325_v40 }
 0x3a3   :  { %2084 = vmatprep.subr.bf16.mxu0 %v2799_v2 }
 0x3a6   :  { %2085 = vmatpush3.bf16.msra.mxu0 %v2326_v41 }
 0x3a7   :  { %2086 = vmatprep.subr.bf16.mxu0 %v2799_v2 }
 0x3aa   :  { %2087 = vmatpush3.bf16.msra.mxu0 %v2327_v53  ;;  %v2355_v53 = vld [vmem:[%s3273_s5 + $0x8] sm:$0xff]  }
 0x3ab   :  { %2088 = vmatprep.subr.bf16.mxu0 %v2799_v2 }
 0x3ae   :  { %2089 = vmatpush3.bf16.msra.mxu0 %v2328_v54  ;;  %v1904_v54 = vld [vmem:[#allocation13] ss:$0 sm:$0xff] }
 0x3af   :  { %2114 = vmatprep.subr.bf16.mxu0 %v2799_v2 }
 0x461   :  { %v573_v43 = vpop.f32.mrf.mxu0 }
 0x462   :  { %v574_v44 = vadd.f32 %v1880_v42, %v573_v43 }
 0x463   :  { %v2072_v45 = vpop.f32.mrf.mxu0 }
 0x464   :  { %v579_v46 = vmax.f32 %v574_v44, 0.0 }
 0x465   :  { %v576_v47 = vpop.f32.mrf.mxu0 }
 0x466   :  { %v580_v48 = vadd.f32 %v579_v46, %v442_v27  ;;  %v2335_v27 = vld [vmem:[%s3271_s30 + $0x8] sm:$0xff]  }
 0x467   :  { %v2073_v49 = vpop.f32.mrf.mxu0 }
 0x468   :  { %v581_v51 = vpack.c.bf16 %v580_v48, %v580_v48  ;;  %v2351_v49 = vld [vmem:[%s3272_s28 + $0x8] sm:$0xff]  }
 0x46a   :  { %2079 = vmatmul.mubr.msk.bf16.vlgmr.msra.gmra.mxu1 %vm467_vm2, %v581_v51 }
 0x46b   :  { %2095 = vmatpush3.bf16.msra.mxu1 %v2323_v50  ;;  %2098 = vmatprep.mubr.msk.bf16.mxu1 %vm2800_vm0, %v2799_v2  ;;  %v2352_v50 = vld [vmem:[%s3272_s28] sm:$0xff]  }
 0x46c   :  { %2096 = vmatprep.subr.bf16.mxu1 %v2799_v2 }
 0x46f   :  { %2097 = vmatpush3.bf16.msra.mxu1 %v2324_v52  ;;  %v2354_v52 = vld [vmem:[%s3273_s5 + $0x10] sm:$0xff]  }
 0x470   :  { %2102 = vmatprep.subr.bf16.mxu1 %v2799_v2 }
 0x472   :  { %2099 = vmatmul.mubr.msk.bf16.vlgmr.msra.gmra.mxu1 %vm467_vm2, %v581_v51  ;;  %v2353_v51 = vld [vmem:[%s3273_s5 + $0x18] sm:$0xff]  }
 0x473   :  { %2110 = vmatprep.mubr.msk.bf16.mxu1 %vm2800_vm0, %v2799_v2  ;;  %2103 = vmatpush3.bf16.msra.mxu1 %v2329_v55  ;;  %v1913_v55 = vld [vmem:[#allocation14] ss:$0 sm:$0xff] }
 0x474   :  { %2104 = vmatprep.subr.bf16.mxu1 %v2799_v2 }
 0x477   :  { %2105 = vmatpush3.bf16.msra.mxu1 %v2330_v56 }
 0x478   :  { %2106 = vmatprep.subr.bf16.mxu1 %v2799_v2 }
 0x47b   :  { %2107 = vmatpush3.bf16.msra.mxu1 %v2331_v6 }
 0x47c   :  { %2108 = vmatprep.subr.bf16.mxu1 %v2799_v2 }
 0x47f   :  { %2109 = vmatpush3.bf16.msra.mxu1 %v2332_v7 }
 0x480   :  { %2134 = vmatprep.subr.bf16.mxu1 %v2799_v2 }
 0x52a   :  { %v642_v58 = vpop.f32.mrf.mxu1 }
 0x52b   :  { %v643_v59 = vadd.f32 %v1884_v57, %v642_v58 }
 0x52c   :  { %v2080_v60 = vpop.f32.mrf.mxu1 }
 0x52d   :  { %v648_v61 = vmax.f32 %v643_v59, 0.0 }
 0x52e   :  { %v645_v62 = vpop.f32.mrf.mxu1 }
 0x52f   :  { %v649_v63 = vpack.c.bf16 %v648_v61, %v648_v61 }
 0x530   :  { %v2081_v0 = vpop.f32.mrf.mxu1 }
 0x531   :  { %2091 = vmatmul.mubr.msk.bf16.vlgmr.msra.gmra.mxu0 %vm689_vm3, %v649_v63 }
 0x532   :  { %v791_v1 = vpop.f32.mrf.mxu1  ;;  %2130 = vmatprep.mubr.msk.bf16.mxu0 %vm2800_vm0, %v2799_v2  ;;  %2115 = vmatpush3.bf16.msra.mxu0 %v2337_v8 }
 0x533   :  { %2116 = vmatprep.subr.bf16.mxu0 %v2799_v2  ;;  %v792_v19 = vadd.f32 %v1894_v15, %v791_v1  ;;  %v2356_v1 = vld [vmem:[%s3273_s5] sm:$0xff]   ;;  %v2361_v15 = vld [vmem:[%s3274_s29 + $0x18] sm:$0xff]  }
 0x534   :  { %v2100_v3 = vpop.f32.mrf.mxu1 }
 0x535   :  { %v1919_v3 = vld [vmem:[#allocation16] ss:$0 sm:$0xff] }
 0x536   :  { %v794_v4 = vpop.f32.mrf.mxu1  ;;  %2117 = vmatpush3.bf16.msra.mxu0 %v2338_v9  ;;  %v2357_v9 = vld [vmem:[%s3274_s29 + $0x38] sm:$0xff]  }
 0x537   :  { %2118 = vmatprep.subr.bf16.mxu0 %v2799_v2 }
 0x538   :  { %v2101_v5 = vpop.f32.mrf.mxu1 }
 0x53a   :  { %2119 = vmatpush3.bf16.msra.mxu0 %v2339_v10 }
 0x53b   :  { %2120 = vmatprep.subr.bf16.mxu0 %v2799_v2 }
 0x53e   :  { %2121 = vmatpush3.bf16.msra.mxu0 %v2340_v11 }
 0x53f   :  { %2122 = vmatprep.subr.bf16.mxu0 %v2799_v2 }
 0x542   :  { %2123 = vmatpush3.bf16.msra.mxu0 %v2341_v12  ;;  %v2358_v12 = vld [vmem:[%s3274_s29 + $0x30] sm:$0xff]  }
 0x543   :  { %2124 = vmatprep.subr.bf16.mxu0 %v2799_v2 }
 0x546   :  { %2125 = vmatpush3.bf16.msra.mxu0 %v2342_v13  ;;  %v2359_v13 = vld [vmem:[%s3274_s29 + $0x28] sm:$0xff]  }
 0x547   :  { %2126 = vmatprep.subr.bf16.mxu0 %v2799_v2 }
 0x54a   :  { %2127 = vmatpush3.bf16.msra.mxu0 %v2343_v29 }
 0x54b   :  { %2128 = vmatprep.subr.bf16.mxu0 %v2799_v2 }
 0x54e   :  { %2129 = vmatpush3.bf16.msra.mxu0 %v2344_v30 }
 0x54f   :  { %2166 = vmatprep.subr.bf16.mxu0 %v2799_v2 }
 0x5f1   :  { %v727_v16 = vpop.f32.mrf.mxu0 }
 0x5f2   :  { %v728_v17 = vadd.f32 %v1888_v14, %v727_v16  ;;  %v2360_v14 = vld [vmem:[%s3274_s29 + $0x20] sm:$0xff]   ;;  %v2362_v16 = vld [vmem:[%s3274_s29 + $0x10] sm:$0xff]  }
 0x5f3   :  { %v2092_v18 = vpop.f32.mrf.mxu0 }
 0x5f4   :  { %v733_v20 = vmax.f32 %v728_v17, 0.0  ;;  %v2363_v17 = vld [vmem:[%s3274_s29 + $0x8] sm:$0xff]   ;;  %v2364_v18 = vld [vmem:[%s3274_s29] sm:$0xff]  }
 0x5f5   :  { %v730_v21 = vpop.f32.mrf.mxu0 }
 0x5f6   :  { %v797_v22 = vadd.f32 %v792_v19, %v733_v20  ;;  %v2365_v19 = vld [vmem:[%s3275_s14 + $0x18] sm:$0xff]   ;;  %v2367_v21 = vld [vmem:[%s3275_s14 + $0x10] sm:$0xff]  }
 0x5f7   :  { %v2093_v23 = vpop.f32.mrf.mxu0  ;;  %v2366_v20 = vld [vmem:[%s3276_s1 + $0x18] sm:$0xff]  }
 0x5f8   :  { %v798_v25 = vpack.c.bf16 %v797_v22, %v797_v22  ;;  %v2368_v22 = vld [vmem:[%s3276_s1 + $0x10] sm:$0xff]   ;;  %v2369_v23 = vld [vmem:[%s3275_s14 + $0x8] sm:$0xff]  }
 0x5fa   :  { %2111 = vmatmul.mubr.msk.bf16.vlgmr.msra.gmra.mxu1 %vm689_vm3, %v798_v25 }
 0x5fb   :  { %2135 = vmatpush3.bf16.msra.mxu1 %v2333_v24  ;;  %2142 = vmatprep.mubr.msk.bf16.mxu1 %vm2800_vm0, %v2799_v2  ;;  %v2370_v24 = vld [vmem:[%s3276_s1 + $0x8] sm:$0xff]  }
 0x5fc   :  { %2136 = vmatprep.subr.bf16.mxu1 %v2799_v2 }
 0x5ff   :  { %2137 = vmatpush3.bf16.msra.mxu1 %v2334_v26  ;;  %v2372_v26 = vld [vmem:[%s3276_s1] sm:$0xff]  }
 0x600   :  { %2138 = vmatprep.subr.bf16.mxu1 %v2799_v2 }
 0x603   :  { %2139 = vmatpush3.bf16.msra.mxu1 %v2335_v27 }
 0x604   :  { %2140 = vmatprep.subr.bf16.mxu1 %v2799_v2 }
 0x607   :  { %2141 = vmatpush3.bf16.msra.mxu1 %v2336_v28 }
 0x608   :  { %2146 = vmatprep.subr.bf16.mxu1 %v2799_v2 }
 0x60a   :  { %2143 = vmatmul.mubr.msk.bf16.vlgmr.msra.gmra.mxu1 %vm689_vm3, %v798_v25  ;;  %v2371_v25 = vld [vmem:[%s3275_s14] sm:$0xff]  }
 0x60b   :  { %2162 = vmatprep.mubr.msk.bf16.mxu1 %vm2800_vm0, %v2799_v2  ;;  %2147 = vmatpush3.bf16.msra.mxu1 %v2345_v31  ;;  %v1928_v31 = vld [vmem:[#allocation17] ss:$0 sm:$0xff] }
 0x60c   :  { %2148 = vmatprep.subr.bf16.mxu1 %v2799_v2 }
 0x60f   :  { %2149 = vmatpush3.bf16.msra.mxu1 %v2346_v32 }
 0x610   :  { %2150 = vmatprep.subr.bf16.mxu1 %v2799_v2 }
 0x613   :  { %2151 = vmatpush3.bf16.msra.mxu1 %v2347_v33  ;;  %v1934_v33 = vld [vmem:[#allocation19] ss:$0 sm:$0xff] }
 0x614   :  { %2152 = vmatprep.subr.bf16.mxu1 %v2799_v2 }
 0x617   :  { %2153 = vmatpush3.bf16.msra.mxu1 %v2348_v34 }
 0x618   :  { %2154 = vmatprep.subr.bf16.mxu1 %v2799_v2 }
 0x61b   :  { %2155 = vmatpush3.bf16.msra.mxu1 %v2349_v35 }
 0x61c   :  { %2156 = vmatprep.subr.bf16.mxu1 %v2799_v2 }
 0x61f   :  { %2157 = vmatpush3.bf16.msra.mxu1 %v2350_v36 }
 0x620   :  { %2158 = vmatprep.subr.bf16.mxu1 %v2799_v2 }
 0x623   :  { %2159 = vmatpush3.bf16.msra.mxu1 %v2351_v49 }
 0x624   :  { %2160 = vmatprep.subr.bf16.mxu1 %v2799_v2 }
 0x627   :  { %2161 = vmatpush3.bf16.msra.mxu1 %v2352_v50 }
 0x628   :  { %2198 = vmatprep.subr.bf16.mxu1 %v2799_v2 }
 0x6ba   :  { %v875_v38 = vpop.f32.mrf.mxu1 }
 0x6bb   :  { %v876_v39 = vadd.f32 %v1898_v37, %v875_v38 }
 0x6bc   :  { %v2112_v40 = vpop.f32.mrf.mxu1 }
 0x6bd   :  { %v881_v41 = vmax.f32 %v876_v39, 0.0  ;;  %v2373_v40 = vld [vmem:[%s3277_s6 + $0x8] sm:$0xff]  }
 0x6be   :  { %v878_v42 = vpop.f32.mrf.mxu1 }
 0x6bf   :  { %v882_v43 = vpack.c.bf16 %v881_v41, %v881_v41 }
 0x6c0   :  { %v2113_v44 = vpop.f32.mrf.mxu1 }
 0x6c1   :  { %2131 = vmatmul.mubr.bf16.vlgmr.msra.gmra.mxu0 %v882_v43  ;;  %v2374_v43 = vld [vmem:[%s3277_s6] sm:$0xff]   ;;  %v1943_v44 = vld [vmem:[#allocation20] ss:$0 sm:$0xff] }
 0x6c2   :  { %2174 = vmatprep.mubr.msk.bf16.mxu0 %vm2800_vm0, %v2799_v2  ;;  %2167 = vmatpush3.bf16.msra.mxu0 %v2353_v51 }
 0x6c3   :  { %2168 = vmatprep.subr.bf16.mxu0 %v2799_v2 }
 0x6c6   :  { %2169 = vmatpush3.bf16.msra.mxu0 %v2354_v52 }
 0x6c7   :  { %2170 = vmatprep.subr.bf16.mxu0 %v2799_v2 }
 0x6ca   :  { %v1068_v45 = vpop.f32.mrf.mxu1  ;;  %2171 = vmatpush3.bf16.msra.mxu0 %v2355_v53 }
 0x6cb   :  { %2172 = vmatprep.subr.bf16.mxu0 %v2799_v2  ;;  %v1069_v59 = vadd.f32 %v1913_v55, %v1068_v45 }
 0x6cc   :  { %v2144_v46 = vpop.f32.mrf.mxu1 }
 0x6ce   :  { %v1071_v47 = vpop.f32.mrf.mxu1  ;;  %2173 = vmatpush3.bf16.msra.mxu0 %v2356_v1 }
 0x6cf   :  { %2178 = vmatprep.subr.bf16.mxu0 %v2799_v2 }
 0x6d0   :  { %v2145_v48 = vpop.f32.mrf.mxu1 }
 0x781   :  { %v988_v56 = vpop.f32.mrf.mxu0 }
 0x782   :  { %v989_v57 = vadd.f32 %v1904_v54, %v988_v56  ;;  %v2375_v56 = vld [vmem:[%s3278_s2 + $0x8] sm:$0xff]  }
 0x783   :  { %v2132_v58 = vpop.f32.mrf.mxu0 }
 0x784   :  { %v994_v60 = vmax.f32 %v989_v57, 0.0  ;;  %v2376_v57 = vld [vmem:[%s3001_s12 + $0x8] sm:$0xff]   ;;  %v2377_v58 = vld [vmem:[%s3278_s2] sm:$0xff]  }
 0x785   :  { %v991_v61 = vpop.f32.mrf.mxu0 }
 0x786   :  { %v1074_v62 = vadd.f32 %v1069_v59, %v994_v60  ;;  %v2378_v59 = vld [vmem:[%s3001_s12] sm:$0xff]   ;;  %v1949_v60 = vld [vmem:[#allocation22] ss:$0 sm:$0xff]  ;;  %v1953_v61 = vld [vmem:[#allocation23] ss:$0 sm:$0xff]  ;;  %s2802_s12 = smov [#allocation28]  }
 0x787   :  { %v2133_v63 = vpop.f32.mrf.mxu0  ;;  %s1815_s8 = sshll.u32 %s2802_s12, 4  ;;  %s1816_s8 = int_to_ptr.vmem [resolvable:$true] %s1815_s8 }
 0x788   :  { %v1075_v0 = vpack.c.bf16 %v1074_v62, %v1074_v62  ;;  %s2700_s7 = scalar_lea.vmem %s1816_s8, 128  ;;  %p2705_p11 = scmp.lt.s32.totalorder %s1816_s8, %s1816_s8 }
 0x789   :  { %p2701_p10 = scmp.ne.s32.totalorder %s1816_s8, %s2700_s7  ;;  %p2706_p12 = scmp.lt.s32.totalorder %s2700_s7, %s2700_s7 }
 0x78a   :  { %2163 = vmatmul.mubr.bf16.vlgmr.msra.gmra.mxu1 %v1075_v0 }
 0x78b   :  { %2206 = vmatprep.mubr.msk.bf16.mxu1 %vm2800_vm0, %v2799_v2  ;;  %2199 = vmatpush3.bf16.msra.mxu1 %v2365_v19  ;;  %p2707_p13 = por %p2706_p12, %p2705_p11 }
 0x78c   :  { %2200 = vmatprep.subr.bf16.mxu1 %v2799_v2 }
 0x78d   :  { %p2708_p0 = pnand %p2707_p13, %p2701_p10 }
 0x78f   :  { %2201 = vmatpush3.bf16.msra.mxu1 %v2367_v21  ;;  %v1963_v21 = vld [vmem:[%s2996_s9] ss:$0 sm:$0xff] }
 0x790   :  { %2202 = vmatprep.subr.bf16.mxu1 %v2799_v2 }
 0x793   :  { %2203 = vmatpush3.bf16.msra.mxu1 %v2369_v23 }
 0x794   :  { %2204 = vmatprep.subr.bf16.mxu1 %v2799_v2 }
 0x797   :  { %2205 = vmatpush3.bf16.msra.mxu1 %v2371_v25 }
 0x798   :  { %2210 = vmatprep.subr.bf16.mxu1 %v2799_v2 }
 0x84a   :  { %v1181_v4 = vpop.f32.mrf.mxu1 }
 0x84b   :  { %v1182_v5 = vadd.f32 %v1919_v3, %v1181_v4 }
 0x84c   :  { %v2164_v6 = vpop.f32.mrf.mxu1 }
 0x84d   :  { %v1187_v7 = vmax.f32 %v1182_v5, 0.0 }
 0x84e   :  { %v1184_v8 = vpop.f32.mrf.mxu1 }
 0x84f   :  { %v1188_v10 = vpack.c.bf16 %v1187_v7, %v1187_v7  ;;  %v2379_v7 = vld [vmem:[#allocation26] sm:$0xff]  }
 0x850   :  { %v2165_v11 = vpop.f32.mrf.mxu1 }
 0x851   :  { %2175 = vmatmul.mubr.msk.bf16.vlgmr.msra.gmra.mxu0 %vm689_vm3, %v1188_v10 }
 0x852   :  { %2179 = vmatpush3.bf16.msra.mxu0 %v2357_v9  ;;  %2194 = vmatprep.mubr.msk.bf16.mxu0 %vm2800_vm0, %v2799_v2  ;;  %v1959_v9 = vld [vmem:[#allocation25] ss:$0 sm:$0xff] }
 0x853   :  { %2180 = vmatprep.subr.bf16.mxu0 %v2799_v2 }
 0x856   :  { %2181 = vmatpush3.bf16.msra.mxu0 %v2358_v12 }
 0x857   :  { %2182 = vmatprep.subr.bf16.mxu0 %v2799_v2 }
 0x85a   :  { %2183 = vmatpush3.bf16.msra.mxu0 %v2359_v13 }
 0x85b   :  { %2184 = vmatprep.subr.bf16.mxu0 %v2799_v2 }
 0x85e   :  { %2185 = vmatpush3.bf16.msra.mxu0 %v2360_v14 }
 0x85f   :  { %2186 = vmatprep.subr.bf16.mxu0 %v2799_v2 }
 0x862   :  { %2187 = vmatpush3.bf16.msra.mxu0 %v2361_v15 }
 0x863   :  { %2188 = vmatprep.subr.bf16.mxu0 %v2799_v2 }
 0x866   :  { %2189 = vmatpush3.bf16.msra.mxu0 %v2362_v16 }
 0x867   :  { %2190 = vmatprep.subr.bf16.mxu0 %v2799_v2 }
 0x86a   :  { %2191 = vmatpush3.bf16.msra.mxu0 %v2363_v17 }
 0x86b   :  { %2192 = vmatprep.subr.bf16.mxu0 %v2799_v2 }
 0x86e   :  { %2193 = vmatpush3.bf16.msra.mxu0 %v2364_v18 }
 0x86f   :  { %2218 = vmatprep.subr.bf16.mxu0 %v2799_v2 }
 0x871   :  { %2195 = vmatmul.mubr.bf16.vlgmr.msra.gmra.mxu0 %v1075_v0 }
 0x872   :  { %2226 = vmatprep.mubr.msk.bf16.mxu0 %vm2800_vm0, %v2799_v2  ;;  %2219 = vmatpush3.bf16.msra.mxu0 %v2366_v20 }
 0x873   :  { %2220 = vmatprep.subr.bf16.mxu0 %v2799_v2 }
 0x876   :  { %2221 = vmatpush3.bf16.msra.mxu0 %v2368_v22  ;;  %v1966_v22 = vld [vmem:[%s3006_s21] ss:$0 sm:$0xff] }
 0x877   :  { %2222 = vmatprep.subr.bf16.mxu0 %v2799_v2 }
 0x87a   :  { %2223 = vmatpush3.bf16.msra.mxu0 %v2370_v24 }
 0x87b   :  { %2224 = vmatprep.subr.bf16.mxu0 %v2799_v2 }
 0x87e   :  { %2225 = vmatpush3.bf16.msra.mxu0 %v2372_v26 }
 0x87f   :  { %2244 = vmatprep.subr.bf16.mxu0 %v2799_v2 }
 0x911   :  { %v1265_v27 = vpop.f32.mrf.mxu0 }
 0x912   :  { %v1266_v32 = vadd.f32 %v1928_v31, %v1265_v27 }
 0x913   :  { %v2176_v28 = vpop.f32.mrf.mxu0 }
 0x914   :  { %v1271_v35 = vmax.f32 %v1266_v32, 0.0 }
 0x915   :  { %v1268_v29 = vpop.f32.mrf.mxu0 }
 0x917   :  { %v2177_v30 = vpop.f32.mrf.mxu0 }
 0x931   :  { %v1377_v34 = vpop.f32.mrf.mxu0 }
 0x932   :  { %v1378_v36 = vadd.f32 %v1934_v33, %v1377_v34 }
 0x933   :  { %v2196_v37 = vpop.f32.mrf.mxu0 }
 0x934   :  { %v1383_v38 = vadd.f32 %v1378_v36, %v1271_v35 }
 0x935   :  { %v1380_v39 = vpop.f32.mrf.mxu0 }
 0x936   :  { %v1384_v41 = vpack.c.bf16 %v1383_v38, %v1383_v38 }
 0x937   :  { %v2197_v42 = vpop.f32.mrf.mxu0 }
 0x938   :  { %2207 = vmatmul.mubr.msk.bf16.vlgmr.msra.gmra.mxu1 %vm689_vm3, %v1384_v41  ;;  %2227 = vmatmul.mubr.msk.bf16.vlgmr.msra.gmra.mxu0 %vm689_vm3, %v1384_v41 }
 0x939   :  { %2211 = vmatpush3.bf16.msra.mxu1 %v2373_v40  ;;  %2214 = vmatprep.mubr.msk.bf16.mxu1 %vm2800_vm0, %v2799_v2 }
 0x93a   :  { %2212 = vmatprep.subr.bf16.mxu1 %v2799_v2  ;;  %2248 = vmatprep.mubr.msk.bf16.mxu0 %vm2800_vm0, %v2799_v2 }
 0x93b   :  { %2245 = vmatpush3.bf16.msra.mxu0 %v2376_v57 }
 0x93c   :  { %2246 = vmatprep.subr.bf16.mxu0 %v2799_v2 }
 0x93d   :  { %2213 = vmatpush3.bf16.msra.mxu1 %v2374_v43 }
 0x93e   :  { %2230 = vmatprep.subr.bf16.mxu1 %v2799_v2 }
 0x93f   :  { %2247 = vmatpush3.bf16.msra.mxu0 %v2378_v59 }
 0x9f8   :  { %v1461_v45 = vpop.f32.mrf.mxu1  ;;  %v1609_v46 = vpop.f32.mrf.mxu0 }
 0x9f9   :  { %v1462_v47 = vadd.f32 %v1943_v44, %v1461_v45  ;;  %v1610_v1 = vadd.f32 %v1953_v61, %v1609_v46 }
 0x9fa   :  { %v2208_v48 = vpop.f32.mrf.mxu1  ;;  %v2228_v49 = vpop.f32.mrf.mxu0 }
 0x9fb   :  { %v1467_v50 = vmax.f32 %v1462_v47, 0.0 }
 0x9fc   :  { %v1464_v51 = vpop.f32.mrf.mxu1  ;;  %v1612_v52 = vpop.f32.mrf.mxu0 }
 0x9fd   :  { %v1468_v53 = vpack.c.bf16 %v1467_v50, %v1467_v50 }
 0x9fe   :  { %v2209_v54 = vpop.f32.mrf.mxu1  ;;  %v2229_v55 = vpop.f32.mrf.mxu0 }
 0x9ff   :  { %2215 = vmatmul.mubr.msk.bf16.vlgmr.msra.gmra.mxu1 %vm467_vm2, %v1468_v53 }
 0xa00   :  { %2234 = vmatprep.mubr.msk.bf16.mxu1 %vm2800_vm0, %v2799_v2  ;;  %2231 = vmatpush3.bf16.msra.mxu1 %v2375_v56 }
 0xa01   :  { %2232 = vmatprep.subr.bf16.mxu1 %v2799_v2 }
 0xa04   :  { %2233 = vmatpush3.bf16.msra.mxu1 %v2377_v58 }
 0xa05   :  { %2238 = vmatprep.subr.bf16.mxu1 %v2799_v2 }
 0xabf   :  { %v1529_v62 = vpop.f32.mrf.mxu1 }
 0xac0   :  { %v1530_v63 = vadd.f32 %v1949_v60, %v1529_v62 }
 0xac1   :  { %v2216_v0 = vpop.f32.mrf.mxu1 }
 0xac2   :  { %v1535_v3 = vmax.f32 %v1530_v63, 0.0 }
 0xac3   :  { %v1532_v4 = vpop.f32.mrf.mxu1 }
 0xac4   :  { %v1615_v5 = vadd.f32 %v1610_v1, %v1535_v3 }
 0xac5   :  { %v2217_v6 = vpop.f32.mrf.mxu1 }
 0xac6   :  { %v1616_v8 = vpack.c.bf16 %v1615_v5, %v1615_v5 }
 0xac8   :  { %2235 = vmatmul.mubr.msk.bf16.vlgmr.msra.gmra.mxu1 %vm467_vm2, %v1616_v8  ;;  %2249 = vmatmul.mubr.msk.bf16.vlgmr.msra.gmra.mxu0 %vm467_vm2, %v1616_v8 }
 0xac9   :  { %2239 = vmatpush3.bf16.msra.mxu1 %v2379_v7  ;;  %2240 = vmatprep.mubr.msk.bf16.mxu1 %vm2800_vm0, %v2799_v2 }
 0xb88   :  { %v1677_v10 = vpop.f32.mrf.mxu1  ;;  %v1801_v11 = vpop.f32.mrf.mxu0 }
 0xb89   :  { %v1678_v12 = vadd.f32 %v1959_v9, %v1677_v10  ;;  %v1802_v2 = vadd.f32 %v1966_v22, %v1801_v11 }
 0xb8a   :  { %v2236_v13 = vpop.f32.mrf.mxu1  ;;  %v2250_v14 = vpop.f32.mrf.mxu0 }
 0xb8b   :  { %v1683_v15 = vmax.f32 %v1678_v12, 0.0 }
 0xb8c   :  { %v1680_v16 = vpop.f32.mrf.mxu1  ;;  %v1804_v17 = vpop.f32.mrf.mxu0 }
 0xb8d   :  { %v1684_v18 = vpack.c.bf16 %v1683_v15, %v1683_v15 }
 0xb8e   :  { %v2237_v19 = vpop.f32.mrf.mxu1  ;;  %v2251_v20 = vpop.f32.mrf.mxu0 }
 0xb8f   :  { %2241 = vmatmul.mubr.msk.bf16.vlgmr.msra.gmra.mxu1 %vm394_vm1, %v1684_v18 }
 0xc4f   :  { %v1737_v23 = vpop.f32.mrf.mxu1 }
 0xc50   :  { %v1738_v24 = vadd.f32 %v1963_v21, %v1737_v23 }
 0xc51   :  { %v2242_v25 = vpop.f32.mrf.mxu1 }
 0xc52   :  { %v1743_v26 = vmax.f32 %v1738_v24, 0.0 }
 0xc53   :  { %v1740_v27 = vpop.f32.mrf.mxu1 }
 0xc54   :  { %v1807_v28 = vadd.f32 %v1802_v2, %v1743_v26 }
 0xc55   :  { %v2243_v29 = vpop.f32.mrf.mxu1 }
 0xc56   :  { %1808 = vst.msk [vmem:[#allocation28] sm:$0xff] %vm394_vm1, %v1807_v28 }
 0xc57   :  { %2711 = shalt.err (!%p2708_p0)
}
 0xc58   :  { %1818 = dma.vmem_to_hbm [thread:$0]  %s1816_s8, 128, %s3011_s27, [#allocation4]  }
 0xc59   :  { %2738 = dma.done.wait [#allocation4], 128  }
 0xc5a   :  { %2739 = vsyncadd [#allocation4], 4294967168 }
 0xc5b   :  { %1822 = vsyncpa [#allocation3], 1 }
 0xc5c   :  { %1823 = vsyncpa [#allocation6], 1 }
 0xc5d   :  { %1824 = vsyncpa [#allocation9], 1 }
 0xc5e   :  { %1825 = vsyncpa [#allocation12], 1 }
 0xc5f   :  { %1826 = vsyncpa [#allocation15], 1 }
 0xc60   :  { %1827 = vsyncpa [#allocation18], 1 }
 0xc61   :  { %1828 = vsyncpa [#allocation21], 1 }
 0xc62   :  { %1829 = vsyncpa [#allocation24], 1 }
 0xc63   :  { %1830 = vsyncpa [#allocation27], 1 }
 0xc64   :  { %1831 = vsyncpa [#allocation4], 1 }

</bundles_post_ra>
